<compile_context>
chip_gen: v7x
topology: tpu7x:2x2x1
jax: 0.10.0
libtpu: 0.0.40
codegen_flags: <defaults>
</compile_context>

<pallas_src>
import functools

import jax
import jax.numpy as jnp
from jax.experimental import pallas as pl
from jax.experimental.pallas import tpu as pltpu

BN_EPS = 1e-5
DROPOUT_P = 0.5
_RESIDENT_BUDGET = 16 * 1024 * 1024  # max bytes (incl. double buffer) for a VMEM-resident operand


def _round_up(x, m):
    return (x + m - 1) // m * m


def _vmem_limit_bytes():
    """Generation-aware scoped-VMEM budget: ~3/4 of physical VMEM, capped at 96 MiB."""
    phys = 128 * 1024 * 1024
    try:
        phys = int(pltpu.get_tpu_info().vmem_capacity_bytes)
    except Exception:
        pass
    return min(phys * 3 // 4, 96 * 1024 * 1024)


def _tiling(n):
    """Row / contraction tile sizes.  512-wide for large N (fills the 256-wide MXU and amortizes
    per-step pipeline overhead); a single (16,128)-aligned full tile for small N."""
    if n >= 512:
        tm = tk = 512
        n_pad = _round_up(n, 512)
    else:
        n_pad = _round_up(max(n, 16), 128)
        tm = tk = n_pad
    return n_pad, tm, tk


def _pad2(x, rows, cols, dtype):
    x = jnp.asarray(x, dtype)
    return jnp.pad(x, ((0, rows - x.shape[0]), (0, cols - x.shape[1])))


# --------------------------------------------------------------------------------------
# Kernel 1: Z = dropout((A_hat @ X) @ W1 + b1) @ W2     (row tile m, accumulated over k)
# --------------------------------------------------------------------------------------
def _conv1_kernel(a_ref, x_ref, w1_ref, b1_ref, mask_ref, w2_ref, z_ref, acc_ref,
                  *, x_resident, tk):
    # program ids are evaluated here (outside pl.when) and only values are captured below.
    k = pl.program_id(1)
    last_k = pl.num_programs(1) - 1

    @pl.when(k == 0)
    def _():
        acc_ref[...] = jnp.zeros_like(acc_ref)

    if x_resident:
        x_tile = x_ref[pl.ds(k * tk, tk), :]    # X is VMEM-resident, slice the k-tile in-kernel
    else:
        x_tile = x_ref[...]
    # A_hat tile @ X tile: bf16 operands, f32 MXU accumulation.
    acc_ref[...] += jnp.dot(a_ref[...], x_tile, preferred_element_type=jnp.float32)

    @pl.when(k == last_k)
    def _():
        # GCNConv-1 linear + bias (f32 epilogue), then dropout via precomputed keep/scale mask.
        h1 = jnp.dot(acc_ref[...].astype(jnp.bfloat16), w1_ref[...],
                     preferred_element_type=jnp.float32) + b1_ref[...]
        h1 = h1 * mask_ref[...].astype(jnp.float32)
        # Fuse GCNConv-2's linear so the HBM intermediate is only (N, D) bf16.
        z_ref[...] = jnp.dot(h1.astype(jnp.bfloat16), w2_ref[...],
                             preferred_element_type=jnp.float32).astype(z_ref.dtype)


# --------------------------------------------------------------------------------------
# Kernel 2: H2 = A_hat @ Z + b2, plus per-row-tile BN partial statistics (padded rows masked)
# --------------------------------------------------------------------------------------
def _conv2_kernel(a_ref, z_ref, b2_ref, h2_ref, psum_ref, psq_ref, acc_ref,
                  *, z_resident, tk, n_real):
    m = pl.program_id(0)
    k = pl.program_id(1)
    last_k = pl.num_programs(1) - 1

    @pl.when(k == 0)
    def _():
        acc_ref[...] = jnp.zeros_like(acc_ref)

    if z_resident:
        z_tile = z_ref[pl.ds(k * tk, tk), :]
    else:
        z_tile = z_ref[...]
    acc_ref[...] += jnp.dot(a_ref[...], z_tile, preferred_element_type=jnp.float32)

    @pl.when(k == last_k)
    def _():
        h2 = acc_ref[...] + b2_ref[...]                    # f32
        h2_ref[...] = h2.astype(h2_ref.dtype)              # bf16 HBM intermediate
        # Mask padded node rows out of the BatchNorm statistics (computed from the f32 values).
        tm = h2.shape[0]
        row = jax.lax.broadcasted_iota(jnp.int32, h2.shape, 0) + m * tm
        h2v = jnp.where(row < n_real, h2, 0.0)
        s = jnp.sum(h2v, axis=0, keepdims=True)            # (1, dp)
        sq = jnp.sum(h2v * h2v, axis=0, keepdims=True)     # (1, dp)
        # Broadcast across 8 sublanes so the store stays sublane/lane dense (divided out later).
        psum_ref[...] = jnp.broadcast_to(s, psum_ref.shape)
        psq_ref[...] = jnp.broadcast_to(sq, psq_ref.shape)


# --------------------------------------------------------------------------------------
# Kernel 3: one-shot BatchNorm statistics finalize -> (scale, shift)
# --------------------------------------------------------------------------------------
def _bn_stats_kernel(psum_ref, psq_ref, gamma_ref, beta_ref, scale_ref, shift_ref, *, n_real):
    denom = 1.0 / (8.0 * n_real)                            # each tile's sum was broadcast x8
    total = jnp.sum(psum_ref[...], axis=0, keepdims=True)   # (1, dp)
    total_sq = jnp.sum(psq_ref[...], axis=0, keepdims=True)
    mean = total * denom
    var = jnp.maximum(total_sq * denom - mean * mean, 0.0)  # biased variance, like torch BN (train)
    inv_std = jax.lax.rsqrt(var + BN_EPS)
    scale = gamma_ref[...] * inv_std                        # (1, dp)
    shift = beta_ref[...] - mean * scale
    scale_ref[...] = jnp.broadcast_to(scale, scale_ref.shape)
    shift_ref[...] = jnp.broadcast_to(shift, shift_ref.shape)


# --------------------------------------------------------------------------------------
# Kernel 4: BatchNorm apply (pure streaming FMA)
# --------------------------------------------------------------------------------------
def _bn_apply_kernel(h2_ref, scale_ref, shift_ref, o_ref):
    o_ref[...] = h2_ref[...].astype(jnp.float32) * scale_ref[0:1, :] + shift_ref[0:1, :]


# --------------------------------------------------------------------------------------
# Wrapper
# --------------------------------------------------------------------------------------
@jax.jit
def graphnn_forward(a_hat, x, w1, b1, w2, b2, gamma, beta, dropout_key):
    n, d = x.shape
    d2 = w1.shape[1]
    dp = _round_up(d, 128)       # lane-dense feature widths
    d2p = _round_up(d2, 128)
    n_pad, tm, tk = _tiling(n)
    gm, gk = n_pad // tm, n_pad // tk
    vmem_limit = _vmem_limit_bytes()

    # bf16 MXU operands (accumulation is f32 in-kernel); f32 bias / BN params.
    a_p = _pad2(a_hat, n_pad, n_pad, jnp.bfloat16)
    x_p = _pad2(x, n_pad, dp, jnp.bfloat16)
    w1_p = _pad2(w1, dp, d2p, jnp.bfloat16)
    w2_p = _pad2(w2, d2p, dp, jnp.bfloat16)
    b1_p = _pad2(b1, 1, d2p, jnp.float32)
    b2_p = _pad2(b2, 1, dp, jnp.float32)
    gamma_p = _pad2(gamma, 1, dp, jnp.float32)
    beta_p = _pad2(beta, 1, dp, jnp.float32)

    # Training-mode dropout: inverted-scaling keep mask (0 or 1/(1-p)), exact in bf16.
    keep = jax.random.bernoulli(dropout_key, p=1.0 - DROPOUT_P, shape=(n_pad, d2p))
    drop_mask = (keep.astype(jnp.float32) * (1.0 / (1.0 - DROPOUT_P))).astype(jnp.bfloat16)

    # X / Z residency: only worth it when the contraction is actually tiled, and when the full
    # (n_pad, dp) bf16 operand (plus its second pipeline buffer) fits a conservative budget.
    operand_bytes = n_pad * dp * 2 * 2
    x_resident = (gk > 1) and (operand_bytes <= _RESIDENT_BUDGET)
    z_resident = x_resident

    if x_resident:
        x_spec = pl.BlockSpec((n_pad, dp), lambda m, k: (0, 0))
        z_spec = pl.BlockSpec((n_pad, dp), lambda m, k: (0, 0))
    else:
        x_spec = pl.BlockSpec((tk, dp), lambda m, k: (k, 0))
        z_spec = pl.BlockSpec((tk, dp), lambda m, k: (k, 0))

    cparams_mk = pltpu.CompilerParams(
        dimension_semantics=("parallel", "arbitrary"),   # row tiles megacore-shard
        vmem_limit_bytes=vmem_limit)
    cparams_m = pltpu.CompilerParams(
        dimension_semantics=("parallel",), vmem_limit_bytes=vmem_limit)

    # ---- Kernel 1: Z = dropout((A @ X) @ W1 + b1) @ W2  -> (n_pad, dp) bf16 ----
    z = pl.pallas_call(
        functools.partial(_conv1_kernel, x_resident=x_resident, tk=tk),
        out_shape=jax.ShapeDtypeStruct((n_pad, dp), jnp.bfloat16),
        grid=(gm, gk),
        in_specs=[
            pl.BlockSpec((tm, tk), lambda m, k: (m, k)),      # A_hat
            x_spec,                                           # X
            pl.BlockSpec((dp, d2p), lambda m, k: (0, 0)),     # W1
            pl.BlockSpec((1, d2p), lambda m, k: (0, 0)),      # b1
            pl.BlockSpec((tm, d2p), lambda m, k: (m, 0)),     # dropout mask
            pl.BlockSpec((d2p, dp), lambda m, k: (0, 0)),     # W2
        ],
        out_specs=pl.BlockSpec((tm, dp), lambda m, k: (m, 0)),
        scratch_shapes=[pltpu.VMEM((tm, dp), jnp.float32)],
        compiler_params=cparams_mk,
    )(a_p, x_p, w1_p, b1_p, drop_mask, w2_p)

    # ---- Kernel 2: H2 = A @ Z + b2 (bf16), plus per-row-tile BN partial (sum, sumsq) ----
    h2, psum, psq = pl.pallas_call(
        functools.partial(_conv2_kernel, z_resident=z_resident, tk=tk, n_real=n),
        out_shape=(
            jax.ShapeDtypeStruct((n_pad, dp), jnp.bfloat16),
            jax.ShapeDtypeStruct((gm * 8, dp), jnp.float32),
            jax.ShapeDtypeStruct((gm * 8, dp), jnp.float32),
        ),
        grid=(gm, gk),
        in_specs=[
            pl.BlockSpec((tm, tk), lambda m, k: (m, k)),      # A_hat
            z_spec,                                           # Z
            pl.BlockSpec((1, dp), lambda m, k: (0, 0)),       # b2
        ],
        out_specs=(
            pl.BlockSpec((tm, dp), lambda m, k: (m, 0)),
            pl.BlockSpec((8, dp), lambda m, k: (m, 0)),
            pl.BlockSpec((8, dp), lambda m, k: (m, 0)),
        ),
        scratch_shapes=[pltpu.VMEM((tm, dp), jnp.float32)],
        compiler_params=cparams_mk,
    )(a_p, z, b2_p)

    # ---- Kernel 3: one-shot BN statistics finalize (tiny, whole arrays in VMEM) ----
    scale, shift = pl.pallas_call(
        functools.partial(_bn_stats_kernel, n_real=n),
        out_shape=(
            jax.ShapeDtypeStruct((8, dp), jnp.float32),
            jax.ShapeDtypeStruct((8, dp), jnp.float32),
        ),
    )(psum, psq, gamma_p, beta_p)

    # ---- Kernel 4: BN apply, pure streaming FMA over row tiles ----
    out = pl.pallas_call(
        _bn_apply_kernel,
        out_shape=jax.ShapeDtypeStruct((n_pad, dp), jnp.float32),
        grid=(gm,),
        in_specs=[
            pl.BlockSpec((tm, dp), lambda m: (m, 0)),
            pl.BlockSpec((8, dp), lambda m: (0, 0)),
            pl.BlockSpec((8, dp), lambda m: (0, 0)),
        ],
        out_specs=pl.BlockSpec((tm, dp), lambda m: (m, 0)),
        compiler_params=cparams_m,
    )(h2, scale, shift)

    return out[:n, :d]


# --------------------------------------------------------------------------------------
# Plain-JAX glue: dense normalized adjacency (matches PyG gcn_norm with remaining self-loops)
# --------------------------------------------------------------------------------------
def build_normalized_adjacency(edge_index, num_nodes):
    src, dst = edge_index[0], edge_index[1]
    a = jnp.zeros((num_nodes, num_nodes), dtype=jnp.float32)
    # messages flow source -> target: out[dst] aggregates x[src]  =>  A[dst, src] += 1
    a = a.at[dst, src].add(1.0)
    diag = jnp.diagonal(a)
    a = a + jnp.diag(jnp.where(diag > 0, 0.0, 1.0))   # add self-loops only where missing
    deg = jnp.sum(a, axis=1)
    d_inv_sqrt = jnp.where(deg > 0, jax.lax.rsqrt(deg), 0.0)
    return a * d_inv_sqrt[:, None] * d_inv_sqrt[None, :]


def xavier_normal(key, shape):
    fan_in, fan_out = shape[0], shape[1]
    std = (2.0 / (fan_in + fan_out)) ** 0.5
    return std * jax.random.normal(key, shape, dtype=jnp.float32)


if __name__ == "__main__":
    NUM_NODES = 64      # num_nodes
    INPUT_DIM = 32      # input_dim  (gnn1: 32 -> 64, gnn2: 64 -> 32)

    key = jax.random.PRNGKey(0)
    k_emb, k_w1, k_w2, k_edges, k_drop = jax.random.split(key, 5)

    embedding = xavier_normal(k_emb, (NUM_NODES, INPUT_DIM))          # nn.Embedding weight
    w1 = xavier_normal(k_w1, (INPUT_DIM, 2 * INPUT_DIM))              # GCNConv1 lin weight
    b1 = jnp.zeros((1, 2 * INPUT_DIM), dtype=jnp.float32)
    w2 = xavier_normal(k_w2, (2 * INPUT_DIM, INPUT_DIM))              # GCNConv2 lin weight
    b2 = jnp.zeros((1, INPUT_DIM), dtype=jnp.float32)
    gamma = jnp.ones((1, INPUT_DIM), dtype=jnp.float32)               # BatchNorm1d weight
    beta = jnp.zeros((1, INPUT_DIM), dtype=jnp.float32)               # BatchNorm1d bias

    # synthetic graph: ring + a few random edges (made symmetric)
    ring_src = jnp.arange(NUM_NODES, dtype=jnp.int32)
    ring_dst = (ring_src + 1) % NUM_NODES
    rnd = jax.random.randint(k_edges, (2, 32), 0, NUM_NODES, dtype=jnp.int32)
    src = jnp.concatenate([ring_src, ring_dst, rnd[0], rnd[1]])
    dst = jnp.concatenate([ring_dst, ring_src, rnd[1], rnd[0]])
    edge_index = jnp.stack([src, dst], axis=0)                        # (2, E)

    a_hat = build_normalized_adjacency(edge_index, NUM_NODES)

    out = graphnn_forward(a_hat, embedding, w1, b1, w2, b2, gamma, beta, k_drop)
    jax.block_until_ready(out)

    assert out.shape == (NUM_NODES, INPUT_DIM)
    assert out.dtype == jnp.float32
    assert bool(jnp.all(jnp.isfinite(out)))
    print("KERNEL_OK")
</pallas_src>

<mosaic_0001>
module attributes {stable_mosaic.version = 11 : i64} {
  func.func @_bn_apply_kernel(%arg0: i32, %arg1: memref<128x128xbf16, #tpu.memory_space<vmem>>, %arg2: memref<8x128xf32, #tpu.memory_space<vmem>>, %arg3: memref<8x128xf32, #tpu.memory_space<vmem>>, %arg4: memref<128x128xf32, #tpu.memory_space<vmem>>) attributes {dimension_semantics = [#tpu.dimension_semantics<parallel>], iteration_bounds = array<i64: 1>, scalar_prefetch = 0 : i64, scratch_operands = 0 : i64, tpu.core_type = #tpu.core_type<tc>, window_params = [{transform_indices = @transform_0, window_bounds = array<i64: 128, 128>}, {pipeline_mode = #tpu.pipeline_mode<synchronous>, transform_indices = @transform_1, window_bounds = array<i64: 8, 128>}, {pipeline_mode = #tpu.pipeline_mode<synchronous>, transform_indices = @transform_2, window_bounds = array<i64: 8, 128>}, {transform_indices = @transform_3, window_bounds = array<i64: 128, 128>}]} {
    %c0 = arith.constant 0 : index
    %c0_0 = arith.constant 0 : index
    %0 = vector.load %arg1[%c0, %c0_0] : memref<128x128xbf16, #tpu.memory_space<vmem>>, vector<128x128xbf16>
    %1 = arith.extf %0 : vector<128x128xbf16> to vector<128x128xf32>
    %c0_1 = arith.constant 0 : index
    %c0_2 = arith.constant 0 : index
    %2 = vector.load %arg2[%c0_1, %c0_2] : memref<8x128xf32, #tpu.memory_space<vmem>>, vector<1x128xf32>
    %3 = vector.broadcast %2 : vector<1x128xf32> to vector<128x128xf32>
    %4 = arith.mulf %1, %3 : vector<128x128xf32>
    %c0_3 = arith.constant 0 : index
    %c0_4 = arith.constant 0 : index
    %5 = vector.load %arg3[%c0_3, %c0_4] : memref<8x128xf32, #tpu.memory_space<vmem>>, vector<1x128xf32>
    %6 = vector.broadcast %5 : vector<1x128xf32> to vector<128x128xf32>
    %7 = arith.addf %4, %6 : vector<128x128xf32>
    %c0_5 = arith.constant 0 : index
    %c0_6 = arith.constant 0 : index
    %8 = vector.load %arg4[%c0_5, %c0_6] : memref<128x128xf32, #tpu.memory_space<vmem>>, vector<128x128xf32>
    tpu.vector_store %arg4[%c0_5, %c0_6], %7 {strides = array<i32>} : memref<128x128xf32, #tpu.memory_space<vmem>>, vector<128x128xf32>,
    return
  }
  func.func @transform_0(%arg0: i32) -> (i32, i32) {
    %c0_i32 = arith.constant 0 : i32
    %c0_i32_0 = arith.constant 0 : i32
    return %arg0, %c0_i32 : i32, i32
  }
  func.func @transform_1(%arg0: i32) -> (i32, i32) {
    %c0_i32 = arith.constant 0 : i32
    %c0_i32_0 = arith.constant 0 : i32
    %c0_i32_1 = arith.constant 0 : i32
    return %c0_i32, %c0_i32_0 : i32, i32
  }
  func.func @transform_2(%arg0: i32) -> (i32, i32) {
    %c0_i32 = arith.constant 0 : i32
    %c0_i32_0 = arith.constant 0 : i32
    %c0_i32_1 = arith.constant 0 : i32
    return %c0_i32, %c0_i32_0 : i32, i32
  }
  func.func @transform_3(%arg0: i32) -> (i32, i32) {
    %c0_i32 = arith.constant 0 : i32
    %c0_i32_0 = arith.constant 0 : i32
    return %arg0, %c0_i32 : i32, i32
  }
}

module attributes {stable_mosaic.version = 11 : i64} {
  func.func @_conv1_kernel(%arg0: i32, %arg1: i32, %arg2: memref<128x128xbf16, #tpu.memory_space<vmem>>, %arg3: memref<128x128xbf16, #tpu.memory_space<vmem>>, %arg4: memref<128x128xbf16, #tpu.memory_space<vmem>>, %arg5: memref<1x128xf32, #tpu.memory_space<vmem>>, %arg6: memref<128x128xbf16, #tpu.memory_space<vmem>>, %arg7: memref<128x128xbf16, #tpu.memory_space<vmem>>, %arg8: memref<128x128xbf16, #tpu.memory_space<vmem>>, %arg9: memref<128x128xf32, #tpu.memory_space<vmem>>) attributes {dimension_semantics = [#tpu.dimension_semantics<parallel>, #tpu.dimension_semantics<arbitrary>], iteration_bounds = array<i64: 1, 1>, scalar_prefetch = 0 : i64, scratch_operands = 1 : i64, tpu.core_type = #tpu.core_type<tc>, window_params = [{transform_indices = @transform_0, window_bounds = array<i64: 128, 128>}, {transform_indices = @transform_1, window_bounds = array<i64: 128, 128>}, {pipeline_mode = #tpu.pipeline_mode<synchronous>, transform_indices = @transform_2, window_bounds = array<i64: 128, 128>}, {pipeline_mode = #tpu.pipeline_mode<synchronous>, transform_indices = @transform_3, window_bounds = array<i64: 1, 128>}, {transform_indices = @transform_4, window_bounds = array<i64: 128, 128>}, {pipeline_mode = #tpu.pipeline_mode<synchronous>, transform_indices = @transform_5, window_bounds = array<i64: 128, 128>}, {transform_indices = @transform_6, window_bounds = array<i64: 128, 128>}]} {
    %c0_i32 = arith.constant 0 : i32
    %0 = arith.cmpi eq, %arg1, %c0_i32 : i32
    %1 = arith.extui %0 : i1 to i32
    %c0_i32_0 = arith.constant 0 : i32
    %2 = arith.cmpi ne, %1, %c0_i32_0 : i32
    scf.if %2 {
      %cst_10 = arith.constant 0.000000e+00 : f32
      %12 = vector.broadcast %cst_10 : f32 to vector<128x128xf32>
      %c0_11 = arith.constant 0 : index
      %c0_12 = arith.constant 0 : index
      %13 = vector.load %arg9[%c0_11, %c0_12] : memref<128x128xf32, #tpu.memory_space<vmem>>, vector<128x128xf32>
      tpu.vector_store %arg9[%c0_11, %c0_12], %12 {strides = array<i32>} : memref<128x128xf32, #tpu.memory_space<vmem>>, vector<128x128xf32>,
    } else {
    }
    %c0 = arith.constant 0 : index
    %c0_1 = arith.constant 0 : index
    %3 = vector.load %arg3[%c0, %c0_1] : memref<128x128xbf16, #tpu.memory_space<vmem>>, vector<128x128xbf16>
    %c0_2 = arith.constant 0 : index
    %c0_3 = arith.constant 0 : index
    %4 = vector.load %arg9[%c0_2, %c0_3] : memref<128x128xf32, #tpu.memory_space<vmem>>, vector<128x128xf32>
    %c0_4 = arith.constant 0 : index
    %c0_5 = arith.constant 0 : index
    %5 = vector.load %arg2[%c0_4, %c0_5] : memref<128x128xbf16, #tpu.memory_space<vmem>>, vector<128x128xbf16>
    %cst = arith.constant dense<0.000000e+00> : vector<128x128xf32>
    %6 = tpu.matmul %5, %3, %cst {dimension_numbers = #tpu.dot_dimension_numbers<[1], [0], [0], [1], [0, 0, 1, 1], [], []>} : vector<128x128xbf16>, vector<128x128xbf16>, vector<128x128xf32> -> vector<128x128xf32>
    %7 = arith.addf %4, %6 : vector<128x128xf32>
    %c0_6 = arith.constant 0 : index
    %c0_7 = arith.constant 0 : index
    %8 = vector.load %arg9[%c0_6, %c0_7] : memref<128x128xf32, #tpu.memory_space<vmem>>, vector<128x128xf32>
    tpu.vector_store %arg9[%c0_6, %c0_7], %7 {strides = array<i32>} : memref<128x128xf32, #tpu.memory_space<vmem>>, vector<128x128xf32>,
    %c0_i32_8 = arith.constant 0 : i32
    %9 = arith.cmpi eq, %arg1, %c0_i32_8 : i32
    %10 = arith.extui %9 : i1 to i32
    %c0_i32_9 = arith.constant 0 : i32
    %11 = arith.cmpi ne, %10, %c0_i32_9 : i32
    scf.if %11 {
      %c0_10 = arith.constant 0 : index
      %c0_11 = arith.constant 0 : index
      %12 = vector.load %arg9[%c0_10, %c0_11] : memref<128x128xf32, #tpu.memory_space<vmem>>, vector<128x128xf32>
      %13 = arith.truncf %12 : vector<128x128xf32> to vector<128x128xbf16>
      %c0_12 = arith.constant 0 : index
      %c0_13 = arith.constant 0 : index
      %14 = vector.load %arg4[%c0_12, %c0_13] : memref<128x128xbf16, #tpu.memory_space<vmem>>, vector<128x128xbf16>
      %cst_14 = arith.constant dense<0.000000e+00> : vector<128x128xf32>
      %15 = tpu.matmul %13, %14, %cst_14 {dimension_numbers = #tpu.dot_dimension_numbers<[1], [0], [0], [1], [0, 0, 1, 1], [], []>} : vector<128x128xbf16>, vector<128x128xbf16>, vector<128x128xf32> -> vector<128x128xf32>
      %c0_15 = arith.constant 0 : index
      %c0_16 = arith.constant 0 : index
      %16 = vector.load %arg5[%c0_15, %c0_16] : memref<1x128xf32, #tpu.memory_space<vmem>>, vector<1x128xf32>
      %17 = vector.broadcast %16 : vector<1x128xf32> to vector<128x128xf32>
      %18 = arith.addf %15, %17 : vector<128x128xf32>
      %c0_17 = arith.constant 0 : index
      %c0_18 = arith.constant 0 : index
      %19 = vector.load %arg6[%c0_17, %c0_18] : memref<128x128xbf16, #tpu.memory_space<vmem>>, vector<128x128xbf16>
      %20 = arith.extf %19 : vector<128x128xbf16> to vector<128x128xf32>
      %21 = arith.mulf %18, %20 : vector<128x128xf32>
      %22 = arith.truncf %21 : vector<128x128xf32> to vector<128x128xbf16>
      %c0_19 = arith.constant 0 : index
      %c0_20 = arith.constant 0 : index
      %23 = vector.load %arg7[%c0_19, %c0_20] : memref<128x128xbf16, #tpu.memory_space<vmem>>, vector<128x128xbf16>
      %cst_21 = arith.constant dense<0.000000e+00> : vector<128x128xf32>
      %24 = tpu.matmul %22, %23, %cst_21 {dimension_numbers = #tpu.dot_dimension_numbers<[1], [0], [0], [1], [0, 0, 1, 1], [], []>} : vector<128x128xbf16>, vector<128x128xbf16>, vector<128x128xf32> -> vector<128x128xf32>
      %25 = arith.truncf %24 : vector<128x128xf32> to vector<128x128xbf16>
      %c0_22 = arith.constant 0 : index
      %c0_23 = arith.constant 0 : index
      %26 = vector.load %arg8[%c0_22, %c0_23] : memref<128x128xbf16, #tpu.memory_space<vmem>>, vector<128x128xbf16>
      tpu.vector_store %arg8[%c0_22, %c0_23], %25 {strides = array<i32>} : memref<128x128xbf16, #tpu.memory_space<vmem>>, vector<128x128xbf16>,
    } else {
    }
    return
  }
  func.func @transform_0(%arg0: i32, %arg1: i32) -> (i32, i32) {
    %c0_i32 = arith.constant 0 : i32
    return %arg0, %arg1 : i32, i32
  }
  func.func @transform_1(%arg0: i32, %arg1: i32) -> (i32, i32) {
    %c0_i32 = arith.constant 0 : i32
    %c0_i32_0 = arith.constant 0 : i32
    return %arg1, %c0_i32 : i32, i32
  }
  func.func @transform_2(%arg0: i32, %arg1: i32) -> (i32, i32) {
    %c0_i32 = arith.constant 0 : i32
    %c0_i32_0 = arith.constant 0 : i32
    %c0_i32_1 = arith.constant 0 : i32
    return %c0_i32, %c0_i32_0 : i32, i32
  }
  func.func @transform_3(%arg0: i32, %arg1: i32) -> (i32, i32) {
    %c0_i32 = arith.constant 0 : i32
    %c0_i32_0 = arith.constant 0 : i32
    %c0_i32_1 = arith.constant 0 : i32
    return %c0_i32, %c0_i32_0 : i32, i32
  }
  func.func @transform_4(%arg0: i32, %arg1: i32) -> (i32, i32) {
    %c0_i32 = arith.constant 0 : i32
    %c0_i32_0 = arith.constant 0 : i32
    return %arg0, %c0_i32 : i32, i32
  }
  func.func @transform_5(%arg0: i32, %arg1: i32) -> (i32, i32) {
    %c0_i32 = arith.constant 0 : i32
    %c0_i32_0 = arith.constant 0 : i32
    %c0_i32_1 = arith.constant 0 : i32
    return %c0_i32, %c0_i32_0 : i32, i32
  }
  func.func @transform_6(%arg0: i32, %arg1: i32) -> (i32, i32) {
    %c0_i32 = arith.constant 0 : i32
    %c0_i32_0 = arith.constant 0 : i32
    return %arg0, %c0_i32 : i32, i32
  }
}

module attributes {stable_mosaic.version = 11 : i64} {
  func.func @_conv2_kernel(%arg0: i32, %arg1: i32, %arg2: memref<128x128xbf16, #tpu.memory_space<vmem>>, %arg3: memref<128x128xbf16, #tpu.memory_space<vmem>>, %arg4: memref<1x128xf32, #tpu.memory_space<vmem>>, %arg5: memref<128x128xbf16, #tpu.memory_space<vmem>>, %arg6: memref<8x128xf32, #tpu.memory_space<vmem>>, %arg7: memref<8x128xf32, #tpu.memory_space<vmem>>, %arg8: memref<128x128xf32, #tpu.memory_space<vmem>>) attributes {dimension_semantics = [#tpu.dimension_semantics<parallel>, #tpu.dimension_semantics<arbitrary>], iteration_bounds = array<i64: 1, 1>, scalar_prefetch = 0 : i64, scratch_operands = 1 : i64, tpu.core_type = #tpu.core_type<tc>, window_params = [{transform_indices = @transform_0, window_bounds = array<i64: 128, 128>}, {transform_indices = @transform_1, window_bounds = array<i64: 128, 128>}, {pipeline_mode = #tpu.pipeline_mode<synchronous>, transform_indices = @transform_2, window_bounds = array<i64: 1, 128>}, {transform_indices = @transform_3, window_bounds = array<i64: 128, 128>}, {transform_indices = @transform_4, window_bounds = array<i64: 8, 128>}, {transform_indices = @transform_5, window_bounds = array<i64: 8, 128>}]} {
    %c0_i32 = arith.constant 0 : i32
    %0 = arith.cmpi eq, %arg1, %c0_i32 : i32
    %1 = arith.extui %0 : i1 to i32
    %c0_i32_0 = arith.constant 0 : i32
    %2 = arith.cmpi ne, %1, %c0_i32_0 : i32
    scf.if %2 {
      %cst_10 = arith.constant 0.000000e+00 : f32
      %12 = vector.broadcast %cst_10 : f32 to vector<128x128xf32>
      %c0_11 = arith.constant 0 : index
      %c0_12 = arith.constant 0 : index
      %13 = vector.load %arg8[%c0_11, %c0_12] : memref<128x128xf32, #tpu.memory_space<vmem>>, vector<128x128xf32>
      tpu.vector_store %arg8[%c0_11, %c0_12], %12 {strides = array<i32>} : memref<128x128xf32, #tpu.memory_space<vmem>>, vector<128x128xf32>,
    } else {
    }
    %c0 = arith.constant 0 : index
    %c0_1 = arith.constant 0 : index
    %3 = vector.load %arg3[%c0, %c0_1] : memref<128x128xbf16, #tpu.memory_space<vmem>>, vector<128x128xbf16>
    %c0_2 = arith.constant 0 : index
    %c0_3 = arith.constant 0 : index
    %4 = vector.load %arg8[%c0_2, %c0_3] : memref<128x128xf32, #tpu.memory_space<vmem>>, vector<128x128xf32>
    %c0_4 = arith.constant 0 : index
    %c0_5 = arith.constant 0 : index
    %5 = vector.load %arg2[%c0_4, %c0_5] : memref<128x128xbf16, #tpu.memory_space<vmem>>, vector<128x128xbf16>
    %cst = arith.constant dense<0.000000e+00> : vector<128x128xf32>
    %6 = tpu.matmul %5, %3, %cst {dimension_numbers = #tpu.dot_dimension_numbers<[1], [0], [0], [1], [0, 0, 1, 1], [], []>} : vector<128x128xbf16>, vector<128x128xbf16>, vector<128x128xf32> -> vector<128x128xf32>
    %7 = arith.addf %4, %6 : vector<128x128xf32>
    %c0_6 = arith.constant 0 : index
    %c0_7 = arith.constant 0 : index
    %8 = vector.load %arg8[%c0_6, %c0_7] : memref<128x128xf32, #tpu.memory_space<vmem>>, vector<128x128xf32>
    tpu.vector_store %arg8[%c0_6, %c0_7], %7 {strides = array<i32>} : memref<128x128xf32, #tpu.memory_space<vmem>>, vector<128x128xf32>,
    %c0_i32_8 = arith.constant 0 : i32
    %9 = arith.cmpi eq, %arg1, %c0_i32_8 : i32
    %10 = arith.extui %9 : i1 to i32
    %c0_i32_9 = arith.constant 0 : i32
    %11 = arith.cmpi ne, %10, %c0_i32_9 : i32
    scf.if %11 {
      %c0_10 = arith.constant 0 : index
      %c0_11 = arith.constant 0 : index
      %12 = vector.load %arg8[%c0_10, %c0_11] : memref<128x128xf32, #tpu.memory_space<vmem>>, vector<128x128xf32>
      %c0_12 = arith.constant 0 : index
      %c0_13 = arith.constant 0 : index
      %13 = vector.load %arg4[%c0_12, %c0_13] : memref<1x128xf32, #tpu.memory_space<vmem>>, vector<1x128xf32>
      %14 = vector.broadcast %13 : vector<1x128xf32> to vector<128x128xf32>
      %15 = arith.addf %12, %14 : vector<128x128xf32>
      %16 = arith.truncf %15 : vector<128x128xf32> to vector<128x128xbf16>
      %c0_14 = arith.constant 0 : index
      %c0_15 = arith.constant 0 : index
      %17 = vector.load %arg5[%c0_14, %c0_15] : memref<128x128xbf16, #tpu.memory_space<vmem>>, vector<128x128xbf16>
      tpu.vector_store %arg5[%c0_14, %c0_15], %16 {strides = array<i32>} : memref<128x128xbf16, #tpu.memory_space<vmem>>, vector<128x128xbf16>,
      %18 = tpu.iota {dimensions = array<i32: 0>} : vector<128x128xi32>
      %c128_i32 = arith.constant 128 : i32
      %19 = arith.muli %arg0, %c128_i32 : i32
      %20 = vector.broadcast %19 : i32 to vector<128x128xi32>
      %21 = arith.addi %18, %20 : vector<128x128xi32>
      %c64_i32 = arith.constant 64 : i32
      %22 = vector.broadcast %c64_i32 : i32 to vector<128x128xi32>
      %23 = arith.cmpi slt, %21, %22 : vector<128x128xi32>
      %cst_16 = arith.constant 0.000000e+00 : f32
      %24 = vector.broadcast %cst_16 : f32 to vector<128x128xf32>
      %25 = arith.select %23, %15, %24 : vector<128x128xi1>, vector<128x128xf32>
      %cst_17 = arith.constant dense<0.000000e+00> : vector<128xf32>
      %26 = vector.multi_reduction <add>, %25, %cst_17 [0] : vector<128x128xf32> to vector<128xf32>
      %27 = vector.shape_cast %26 : vector<128xf32> to vector<1x128xf32>
      %28 = arith.mulf %25, %25 : vector<128x128xf32>
      %cst_18 = arith.constant dense<0.000000e+00> : vector<128xf32>
      %29 = vector.multi_reduction <add>, %28, %cst_18 [0] : vector<128x128xf32> to vector<128xf32>
      %30 = vector.shape_cast %29 : vector<128xf32> to vector<1x128xf32>
      %31 = vector.shape_cast %27 : vector<1x128xf32> to vector<1x128xf32>
      %32 = vector.broadcast %31 : vector<1x128xf32> to vector<8x128xf32>
      %c0_19 = arith.constant 0 : index
      %c0_20 = arith.constant 0 : index
      %33 = vector.load %arg6[%c0_19, %c0_20] : memref<8x128xf32, #tpu.memory_space<vmem>>, vector<8x128xf32>
      tpu.vector_store %arg6[%c0_19, %c0_20], %32 {strides = array<i32>} : memref<8x128xf32, #tpu.memory_space<vmem>>, vector<8x128xf32>,
      %34 = vector.shape_cast %30 : vector<1x128xf32> to vector<1x128xf32>
      %35 = vector.broadcast %34 : vector<1x128xf32> to vector<8x128xf32>
      %c0_21 = arith.constant 0 : index
      %c0_22 = arith.constant 0 : index
      %36 = vector.load %arg7[%c0_21, %c0_22] : memref<8x128xf32, #tpu.memory_space<vmem>>, vector<8x128xf32>
      tpu.vector_store %arg7[%c0_21, %c0_22], %35 {strides = array<i32>} : memref<8x128xf32, #tpu.memory_space<vmem>>, vector<8x128xf32>,
    } else {
    }
    return
  }
  func.func @transform_0(%arg0: i32, %arg1: i32) -> (i32, i32) {
    %c0_i32 = arith.constant 0 : i32
    return %arg0, %arg1 : i32, i32
  }
  func.func @transform_1(%arg0: i32, %arg1: i32) -> (i32, i32) {
    %c0_i32 = arith.constant 0 : i32
    %c0_i32_0 = arith.constant 0 : i32
    return %arg1, %c0_i32 : i32, i32
  }
  func.func @transform_2(%arg0: i32, %arg1: i32) -> (i32, i32) {
    %c0_i32 = arith.constant 0 : i32
    %c0_i32_0 = arith.constant 0 : i32
    %c0_i32_1 = arith.constant 0 : i32
    return %c0_i32, %c0_i32_0 : i32, i32
  }
  func.func @transform_3(%arg0: i32, %arg1: i32) -> (i32, i32) {
    %c0_i32 = arith.constant 0 : i32
    %c0_i32_0 = arith.constant 0 : i32
    return %arg0, %c0_i32 : i32, i32
  }
  func.func @transform_4(%arg0: i32, %arg1: i32) -> (i32, i32) {
    %c0_i32 = arith.constant 0 : i32
    %c0_i32_0 = arith.constant 0 : i32
    return %arg0, %c0_i32 : i32, i32
  }
  func.func @transform_5(%arg0: i32, %arg1: i32) -> (i32, i32) {
    %c0_i32 = arith.constant 0 : i32
    %c0_i32_0 = arith.constant 0 : i32
    return %arg0, %c0_i32 : i32, i32
  }
}

module attributes {stable_mosaic.version = 11 : i64} {
  func.func @_bn_stats_kernel(%arg0: memref<8x128xf32, #tpu.memory_space<vmem>>, %arg1: memref<8x128xf32, #tpu.memory_space<vmem>>, %arg2: memref<1x128xf32, #tpu.memory_space<vmem>>, %arg3: memref<1x128xf32, #tpu.memory_space<vmem>>, %arg4: memref<8x128xf32, #tpu.memory_space<vmem>>, %arg5: memref<8x128xf32, #tpu.memory_space<vmem>>) attributes {dimension_semantics = [], scalar_prefetch = 0 : i64, scratch_operands = 0 : i64, tpu.core_type = #tpu.core_type<tc>} {
    %c0 = arith.constant 0 : index
    %c0_0 = arith.constant 0 : index
    %0 = vector.load %arg0[%c0, %c0_0] : memref<8x128xf32, #tpu.memory_space<vmem>>, vector<8x128xf32>
    %cst = arith.constant dense<0.000000e+00> : vector<128xf32>
    %1 = vector.multi_reduction <add>, %0, %cst [0] : vector<8x128xf32> to vector<128xf32>
    %2 = vector.shape_cast %1 : vector<128xf32> to vector<1x128xf32>
    %c0_1 = arith.constant 0 : index
    %c0_2 = arith.constant 0 : index
    %3 = vector.load %arg1[%c0_1, %c0_2] : memref<8x128xf32, #tpu.memory_space<vmem>>, vector<8x128xf32>
    %cst_3 = arith.constant dense<0.000000e+00> : vector<128xf32>
    %4 = vector.multi_reduction <add>, %3, %cst_3 [0] : vector<8x128xf32> to vector<128xf32>
    %5 = vector.shape_cast %4 : vector<128xf32> to vector<1x128xf32>
    %cst_4 = arith.constant 0.001953125 : f32
    %6 = vector.broadcast %cst_4 : f32 to vector<1x128xf32>
    %7 = arith.mulf %2, %6 : vector<1x128xf32>
    %cst_5 = arith.constant 0.001953125 : f32
    %8 = vector.broadcast %cst_5 : f32 to vector<1x128xf32>
    %9 = arith.mulf %5, %8 : vector<1x128xf32>
    %10 = arith.mulf %7, %7 : vector<1x128xf32>
    %11 = arith.subf %9, %10 : vector<1x128xf32>
    %cst_6 = arith.constant 0.000000e+00 : f32
    %12 = vector.broadcast %cst_6 : f32 to vector<1x128xf32>
    %13 = arith.maximumf %11, %12 : vector<1x128xf32>
    %cst_7 = arith.constant 9.99999974E-6 : f32
    %14 = vector.broadcast %cst_7 : f32 to vector<1x128xf32>
    %15 = arith.addf %13, %14 : vector<1x128xf32>
    %16 = math.rsqrt %15 : vector<1x128xf32>
    %c0_8 = arith.constant 0 : index
    %c0_9 = arith.constant 0 : index
    %17 = vector.load %arg2[%c0_8, %c0_9] : memref<1x128xf32, #tpu.memory_space<vmem>>, vector<1x128xf32>
    %18 = arith.mulf %17, %16 : vector<1x128xf32>
    %c0_10 = arith.constant 0 : index
    %c0_11 = arith.constant 0 : index
    %19 = vector.load %arg3[%c0_10, %c0_11] : memref<1x128xf32, #tpu.memory_space<vmem>>, vector<1x128xf32>
    %20 = arith.mulf %7, %18 : vector<1x128xf32>
    %21 = arith.subf %19, %20 : vector<1x128xf32>
    %22 = vector.shape_cast %18 : vector<1x128xf32> to vector<1x128xf32>
    %23 = vector.broadcast %22 : vector<1x128xf32> to vector<8x128xf32>
    %c0_12 = arith.constant 0 : index
    %c0_13 = arith.constant 0 : index
    %24 = vector.load %arg4[%c0_12, %c0_13] : memref<8x128xf32, #tpu.memory_space<vmem>>, vector<8x128xf32>
    tpu.vector_store %arg4[%c0_12, %c0_13], %23 {strides = array<i32>} : memref<8x128xf32, #tpu.memory_space<vmem>>, vector<8x128xf32>,
    %25 = vector.shape_cast %21 : vector<1x128xf32> to vector<1x128xf32>
    %26 = vector.broadcast %25 : vector<1x128xf32> to vector<8x128xf32>
    %c0_14 = arith.constant 0 : index
    %c0_15 = arith.constant 0 : index
    %27 = vector.load %arg5[%c0_14, %c0_15] : memref<8x128xf32, #tpu.memory_space<vmem>>, vector<8x128xf32>
    tpu.vector_store %arg5[%c0_14, %c0_15], %26 {strides = array<i32>} : memref<8x128xf32, #tpu.memory_space<vmem>>, vector<8x128xf32>,
    return
  }
}

</mosaic_0001>

<bundles_post_ra>
// kernel: graphnn_forward.7
= control target key start
LH: loop header
LB: loop body
LE: loop exit
PB: predicated region body
PF: predicated region fallthrough
CT: control target
= control target key end

     0   :  { %8 = vsyncpa [#allocation3], 0  ;;  %s386_s0 = inlined_call_operand.hbm [shape: bf16[128,128], index: 0, kind: input, shape index: {}]   ;;  %s387_s1 = inlined_call_operand.hbm [shape: f32[8,128], index: 1, kind: input, shape index: {}]   ;;  %s388_s2 = inlined_call_operand.hbm [shape: f32[8,128], index: 2, kind: input, shape index: {}]   ;;  %s389_s3 = inlined_call_operand.hbm [shape: f32[128,128], index: 3, kind: output, shape index: {}]  }
   0x1   :  { %9 = vsyncpa [#allocation6], 0 }
   0x2   :  { %10 = vsyncpa [#allocation4], 0  ;;  %s303_s12 = smov [#allocation5]   ;;  %s304_s14 = smov [#allocation2]  }
   0x3   :  { %s29_s13 = sshll.u32 %s303_s12, 4  ;;  %s16_s15 = sshll.u32 %s304_s14, 4  ;;  %s30_s13 = int_to_ptr.vmem [resolvable:$true] %s29_s13  ;;  %s331_s15 = int_to_ptr.vmem [resolvable:$true] %s16_s15 }
   0x4   :  { %s209_s18 = scalar_lea.hbm %s387_s1, 128 }
   0x5   :  { %p210_p0 = scmp.ne.s32.totalorder %s387_s1, %s209_s18  ;;  %p213_p1 = scmp.lt.u32.totalorder %s209_s18, %s387_s1 }
   0x7   :  { %p215_p2 = pnand %p213_p1, %p210_p0 }
   0x9   :  { %218 = shalt.err (!%p215_p2)
}
   0xa   :  { %s219_s23 = scalar_lea.vmem %s30_s13, 128  ;;  %p224_p4 = scmp.lt.s32.totalorder %s30_s13, %s30_s13 }
   0xb   :  { %p220_p3 = scmp.ne.s32.totalorder %s30_s13, %s219_s23  ;;  %p225_p5 = scmp.lt.s32.totalorder %s219_s23, %s219_s23 }
   0xd   :  { %p226_p6 = por %p225_p5, %p224_p4 }
   0xf   :  { %p227_p7 = pnand %p226_p6, %p220_p3 }
  0x11   :  { %230 = shalt.err (!%p227_p7)
}
  0x12   :  { %32 = dma.hbm_to_vmem [thread:$0]  %s387_s1, 128, %s30_s13, [#allocation6]  }
  0x13   :  { %s231_s28 = scalar_lea.hbm %s386_s0, 1024 }
  0x14   :  { %p232_p8 = scmp.ne.s32.totalorder %s386_s0, %s231_s28  ;;  %p235_p9 = scmp.lt.u32.totalorder %s231_s28, %s386_s0 }
  0x16   :  { %p237_p10 = pnand %p235_p9, %p232_p8 }
  0x18   :  { %240 = shalt.err (!%p237_p10)
}
  0x19   :  { %s241_s6 = scalar_lea.vmem %s331_s15, 1024  ;;  %p246_p12 = scmp.lt.s32.totalorder %s331_s15, %s331_s15 }
  0x1a   :  { %p242_p11 = scmp.ne.s32.totalorder %s331_s15, %s241_s6  ;;  %p247_p13 = scmp.lt.s32.totalorder %s241_s6, %s241_s6 }
  0x1c   :  { %p248_p0 = por %p247_p13, %p246_p12 }
  0x1e   :  { %p249_p1 = pnand %p248_p0, %p242_p11 }
  0x20   :  { %252 = shalt.err (!%p249_p1)
}
  0x21   :  { %s305_s1 = smov 64   ;;  %s306_s7 = smov 4  }
  0x22   :  { %22 = dma.hbm_to_vmem [thread:$0]  %s386_s0, 1024, %s331_s15, [#allocation3], %s305_s1, %s305_s1, %s306_s7  }
  0x23   :  { %s307_s10 = smov [#allocation7]   ;;  %s253_s14 = scalar_lea.hbm %s388_s2, 128 }
  0x24   :  { %s39_s11 = sshll.u32 %s307_s10, 4  ;;  %p254_p2 = scmp.ne.s32.totalorder %s388_s2, %s253_s14  ;;  %s40_s11 = int_to_ptr.vmem [resolvable:$true] %s39_s11 }
  0x25   :  { %p257_p3 = scmp.lt.u32.totalorder %s253_s14, %s388_s2 }
  0x27   :  { %p259_p4 = pnand %p257_p3, %p254_p2 }
  0x29   :  { %262 = shalt.err (!%p259_p4)
}
  0x2a   :  { %s263_s20 = scalar_lea.vmem %s40_s11, 128  ;;  %p268_p6 = scmp.lt.s32.totalorder %s40_s11, %s40_s11 }
  0x2b   :  { %p264_p5 = scmp.ne.s32.totalorder %s40_s11, %s263_s20  ;;  %p269_p7 = scmp.lt.s32.totalorder %s263_s20, %s263_s20 }
  0x2d   :  { %p270_p8 = por %p269_p7, %p268_p6 }
  0x2f   :  { %p271_p9 = pnand %p270_p8, %p264_p5 }
  0x31   :  { %274 = shalt.err (!%p271_p9)
}
  0x32   :  { %42 = dma.hbm_to_vmem [thread:$0]  %s388_s2, 128, %s40_s11, [#allocation6]  }
  0x33   :  { %297 = dma.done.wait [#allocation3], 1024  }
  0x34   :  { %298 = vsyncadd [#allocation3], 4294966272 }
  0x35   :  { %299 = dma.done.wait [#allocation6], 256  }
  0x36   :  { %300 = vsyncadd [#allocation6], 4294967040  ;;  %v163_v0 = vld [vmem:[#allocation2] sm:$0xff]   ;;  %v194_v4 = vld [vmem:[#allocation2 + $0x8] sm:$0xff]   ;;  %s308_s2 = smov [#allocation8]  }
  0x37   :  { %v160_v1 = vld [vmem:[#allocation5] ss:$0 sm:$0xff]  ;;  %v164_v2 = vunpack.c.l.bf16 %v163_v0  ;;  %v165_v3 = vunpack.c.h.bf16 %v163_v0  ;;  %v195_v5 = vld [vmem:[#allocation2 + $0x10] sm:$0xff]   ;;  %v196_v6 = vld [vmem:[#allocation2 + $0x18] sm:$0xff]   ;;  %v168_v8 = vunpack.c.l.bf16 %v194_v4  ;;  %v169_v9 = vunpack.c.h.bf16 %v194_v4  ;;  %s147_s21 = sshll.u32 %s308_s2, 4  ;;  %s148_s21 = int_to_ptr.vmem [resolvable:$true] %s147_s21 }
  0x38   :  { %v161_v7 = vld [vmem:[#allocation7] ss:$0 sm:$0xff]  ;;  %v172_v10 = vunpack.c.l.bf16 %v195_v5  ;;  %v173_v11 = vunpack.c.h.bf16 %v195_v5  ;;  %v176_v14 = vunpack.c.l.bf16 %v196_v6  ;;  %v177_v15 = vunpack.c.h.bf16 %v196_v6  ;;  %v197_v20 = vld [vmem:[#allocation2 + $0x20] sm:$0xff]   ;;  %v199_v26 = vld [vmem:[#allocation2 + $0x30] sm:$0xff]   ;;  %s275_s22 = scalar_lea.vmem %s148_s21, 2048  ;;  %p280_p11 = scmp.lt.s32.totalorder %s148_s21, %s148_s21 }
  0x39   :  { %v89_v12 = vmul.f32 %v164_v2, %v160_v1  ;;  %v90_v13 = vmul.f32 %v165_v3, %v160_v1  ;;  %v91_v16 = vmul.f32 %v168_v8, %v160_v1  ;;  %v92_v17 = vmul.f32 %v169_v9, %v160_v1  ;;  %v198_v25 = vld [vmem:[#allocation2 + $0x28] sm:$0xff]   ;;  %v200_v31 = vld [vmem:[#allocation2 + $0x38] sm:$0xff]   ;;  %p276_p10 = scmp.ne.s32.totalorder %s148_s21, %s275_s22  ;;  %p281_p12 = scmp.lt.s32.totalorder %s275_s22, %s275_s22 }
  0x3a   :  { %v93_v18 = vmul.f32 %v172_v10, %v160_v1  ;;  %v94_v19 = vmul.f32 %v173_v11, %v160_v1  ;;  %v95_v23 = vmul.f32 %v176_v14, %v160_v1  ;;  %v96_v24 = vmul.f32 %v177_v15, %v160_v1 }
  0x3b   :  { %v110_v21 = vadd.f32 %v161_v7, %v89_v12  ;;  %v111_v22 = vadd.f32 %v161_v7, %v90_v13  ;;  %v112_v27 = vadd.f32 %v161_v7, %v91_v16  ;;  %v113_v28 = vadd.f32 %v161_v7, %v92_v17  ;;  %p282_p13 = por %p281_p12, %p280_p11 }
  0x3c   :  { %v114_v29 = vadd.f32 %v161_v7, %v93_v18  ;;  %v115_v30 = vadd.f32 %v161_v7, %v94_v19  ;;  %v116_v32 = vadd.f32 %v161_v7, %v95_v23  ;;  %v117_v33 = vadd.f32 %v161_v7, %v96_v24 }
  0x3d   :  { %126 = vst [vmem:[#allocation8] sm:$0xff] %v110_v21  ;;  %127 = vst [vmem:[#allocation8 + $0x8] sm:$0xff] %v111_v22  ;;  %v180_v34 = vunpack.c.l.bf16 %v197_v20  ;;  %v181_v35 = vunpack.c.h.bf16 %v197_v20  ;;  %v184_v36 = vunpack.c.l.bf16 %v198_v25  ;;  %v185_v37 = vunpack.c.h.bf16 %v198_v25  ;;  %p283_p0 = pnand %p282_p13, %p276_p10 }
  0x3e   :  { %128 = vst [vmem:[#allocation8 + $0x10] sm:$0xff] %v112_v27  ;;  %129 = vst [vmem:[#allocation8 + $0x18] sm:$0xff] %v113_v28  ;;  %v188_v38 = vunpack.c.l.bf16 %v199_v26  ;;  %v189_v39 = vunpack.c.h.bf16 %v199_v26  ;;  %v192_v42 = vunpack.c.l.bf16 %v200_v31  ;;  %v193_v43 = vunpack.c.h.bf16 %v200_v31 }
  0x3f   :  { %130 = vst [vmem:[#allocation8 + $0x20] sm:$0xff] %v114_v29  ;;  %131 = vst [vmem:[#allocation8 + $0x28] sm:$0xff] %v115_v30  ;;  %v97_v40 = vmul.f32 %v180_v34, %v160_v1  ;;  %v98_v41 = vmul.f32 %v181_v35, %v160_v1  ;;  %v99_v44 = vmul.f32 %v184_v36, %v160_v1 }
  0x40   :  { %132 = vst [vmem:[#allocation8 + $0x30] sm:$0xff] %v116_v32  ;;  %133 = vst [vmem:[#allocation8 + $0x38] sm:$0xff] %v117_v33  ;;  %v100_v45 = vmul.f32 %v185_v37, %v160_v1  ;;  %v101_v46 = vmul.f32 %v188_v38, %v160_v1  ;;  %v102_v47 = vmul.f32 %v189_v39, %v160_v1 }
  0x41   :  { %v118_v48 = vadd.f32 %v161_v7, %v97_v40  ;;  %v119_v49 = vadd.f32 %v161_v7, %v98_v41  ;;  %v103_v50 = vmul.f32 %v192_v42, %v160_v1  ;;  %v104_v51 = vmul.f32 %v193_v43, %v160_v1 }
  0x42   :  { %v120_v52 = vadd.f32 %v161_v7, %v99_v44  ;;  %v121_v53 = vadd.f32 %v161_v7, %v100_v45  ;;  %v122_v54 = vadd.f32 %v161_v7, %v101_v46  ;;  %v123_v55 = vadd.f32 %v161_v7, %v102_v47 }
  0x43   :  { %134 = vst [vmem:[#allocation8 + $0x40] sm:$0xff] %v118_v48  ;;  %135 = vst [vmem:[#allocation8 + $0x48] sm:$0xff] %v119_v49  ;;  %v124_v56 = vadd.f32 %v161_v7, %v103_v50  ;;  %v125_v57 = vadd.f32 %v161_v7, %v104_v51 }
  0x44   :  { %136 = vst [vmem:[#allocation8 + $0x50] sm:$0xff] %v120_v52  ;;  %137 = vst [vmem:[#allocation8 + $0x58] sm:$0xff] %v121_v53 }
  0x45   :  { %138 = vst [vmem:[#allocation8 + $0x60] sm:$0xff] %v122_v54  ;;  %139 = vst [vmem:[#allocation8 + $0x68] sm:$0xff] %v123_v55 }
  0x46   :  { %140 = vst [vmem:[#allocation8 + $0x70] sm:$0xff] %v124_v56  ;;  %141 = vst [vmem:[#allocation8 + $0x78] sm:$0xff] %v125_v57 }
  0x47   :  { %286 = shalt.err (!%p283_p0)
}
  0x48   :  { %s287_s25 = scalar_lea.hbm %s389_s3, 2048 }
  0x49   :  { %p288_p1 = scmp.ne.s32.totalorder %s389_s3, %s287_s25  ;;  %p291_p2 = scmp.lt.u32.totalorder %s287_s25, %s389_s3 }
  0x4b   :  { %p293_p3 = pnand %p291_p2, %p288_p1 }
  0x4d   :  { %296 = shalt.err (!%p293_p3)
}
  0x4e   :  { %s309_s30 = smov 128   ;;  %s310_s4 = smov 8  }
  0x4f   :  { %153 = dma.vmem_to_hbm [thread:$0]  %s148_s21, 2048, %s389_s3, [#allocation4], %s309_s30, %s309_s30, %s310_s4  }
  0x50   :  { %301 = dma.done.wait [#allocation4], 2048  }
  0x51   :  { %302 = vsyncadd [#allocation4], 4294965248 }
  0x52   :  { %157 = vsyncpa [#allocation3], 1 }
  0x53   :  { %158 = vsyncpa [#allocation6], 1 }
  0x54   :  { %159 = vsyncpa [#allocation4], 1 }

// kernel: graphnn_forward.6
= control target key start
LH: loop header
LB: loop body
LE: loop exit
PB: predicated region body
PF: predicated region fallthrough
CT: control target
= control target key end

     0   :  { %11 = vsyncpa [#allocation3], 0  ;;  %s257_s0 = inlined_call_operand.vmem [shape: f32[8,128], index: 0, kind: input, shape index: {}]   ;;  %s258_s1 = inlined_call_operand.hbm [shape: f32[8,128], index: 1, kind: input, shape index: {}]   ;;  %s259_s2 = inlined_call_operand.vmem [shape: f32[1,128], index: 2, kind: input, shape index: {}]   ;;  %s260_s3 = inlined_call_operand.vmem [shape: f32[1,128], index: 3, kind: input, shape index: {}]   ;;  %s261_s4 = inlined_call_operand.hbm [shape: f32[8,128], index: 4, kind: output, shape index: {0}]   ;;  %s262_s5 = inlined_call_operand.hbm [shape: f32[8,128], index: 5, kind: output, shape index: {1}]  }
   0x1   :  { %12 = vsyncpa [#allocation4], 0 }
   0x2   :  { %13 = vsyncpa [#allocation7], 0  ;;  %s179_s18 = smov [#allocation2]   ;;  %s107_s22 = scalar_lea.hbm %s258_s1, 128 }
   0x3   :  { %s22_s19 = sshll.u32 %s179_s18, 4  ;;  %p108_p0 = scmp.ne.s32.totalorder %s258_s1, %s107_s22  ;;  %s23_s19 = int_to_ptr.vmem [resolvable:$true] %s22_s19 }
   0x4   :  { %p111_p1 = scmp.lt.u32.totalorder %s107_s22, %s258_s1 }
   0x6   :  { %p113_p2 = pnand %p111_p1, %p108_p0 }
   0x8   :  { %116 = shalt.err (!%p113_p2)
}
   0x9   :  { %s117_s27 = scalar_lea.vmem %s23_s19, 128  ;;  %p122_p4 = scmp.lt.s32.totalorder %s23_s19, %s23_s19 }
   0xa   :  { %p118_p3 = scmp.ne.s32.totalorder %s23_s19, %s117_s27  ;;  %p123_p5 = scmp.lt.s32.totalorder %s117_s27, %s117_s27 }
   0xc   :  { %p124_p6 = por %p123_p5, %p122_p4 }
   0xe   :  { %p125_p7 = pnand %p124_p6, %p118_p3 }
  0x10   :  { %128 = shalt.err (!%p125_p7)
}
  0x11   :  { %25 = dma.hbm_to_vmem [thread:$0]  %s258_s1, 128, %s23_s19, [#allocation3]  }
  0x12   :  { %173 = dma.done.wait [#allocation3], 128  }
  0x13   :  { %174 = vsyncadd [#allocation3], 4294967168  ;;  %v33_v0 = vld [vmem:[%s257_s0] sm:$0xff]  ;;  %v60_v20 = vlaneseq  ;;  %s180_s7 = smov [#allocation5]   ;;  %s181_s11 = smov [#allocation6]  }
  0x14   :  { %v40_v1 = vld [vmem:[#allocation2] sm:$0xff]  ;;  %v34_v2 = vrot.slane %v33_v0, 4  ;;  %s79_s8 = sshll.u32 %s180_s7, 4  ;;  %s89_s12 = sshll.u32 %s181_s11, 4  ;;  %s80_s8 = int_to_ptr.vmem [resolvable:$true] %s79_s8  ;;  %s90_s12 = int_to_ptr.vmem [resolvable:$true] %s89_s12 }
  0x15   :  { %v41_v3 = vrot.slane %v40_v1, 4  ;;  %v61_v21 = vshrl.u32 %v60_v20, 7  ;;  %v54_v22 = vld [vmem:[%s259_s2] sm:$0x1]  ;;  %s129_s13 = scalar_lea.vmem %s80_s8, 128  ;;  %p134_p9 = scmp.lt.s32.totalorder %s80_s8, %s80_s8 }
  0x16   :  { %v35_v4 = vadd.f32 %v34_v2, %v33_v0  ;;  %v56_v26 = vld [vmem:[%s260_s3] sm:$0x1]  ;;  %p130_p8 = scmp.ne.s32.totalorder %s80_s8, %s129_s13  ;;  %p135_p10 = scmp.lt.s32.totalorder %s129_s13, %s129_s13 }
  0x17   :  { %v42_v5 = vadd.f32 %v41_v3, %v40_v1  ;;  %v62_v23 = vsub.s32 0, %v61_v21 }
  0x18   :  { %v36_v6 = vrot.slane %v35_v4, 2  ;;  %p136_p11 = por %p135_p10, %p134_p9 }
  0x19   :  { %v43_v7 = vrot.slane %v42_v5, 2 }
  0x1a   :  { %v37_v8 = vadd.f32 %v36_v6, %v35_v4  ;;  %p137_p12 = pnand %p136_p11, %p130_p8 }
  0x1b   :  { %v44_v9 = vadd.f32 %v43_v7, %v42_v5 }
  0x1c   :  { %v38_v10 = vrot.slane %v37_v8, 1 }
  0x1d   :  { %v45_v11 = vrot.slane %v44_v9, 1 }
  0x1e   :  { %v39_v12 = vadd.f32 %v38_v10, %v37_v8 }
  0x1f   :  { %v46_v13 = vadd.f32 %v45_v11, %v44_v9 }
  0x20   :  { %v47_v14 = vmul.f32 0.001953125, %v39_v12 }
  0x21   :  { %v48_v15 = vmul.f32 0.001953125, %v46_v13 }
  0x22   :  { %v49_v16 = vmul.f32 %v47_v14, %v47_v14 }
  0x24   :  { %v50_v17 = vsub.f32 %v48_v15, %v49_v16 }
  0x26   :  { %v51_v18 = vmax.f32 %v50_v17, 0.0 }
  0x28   :  { %v52_v19 = vadd.f32 1e-05, %v51_v18 }
  0x2a   :  { %105 = vrsqrt.f32 %v52_v19 }
  0x34   :  { %v106_v24 = vpop.eup %105 }
  0x35   :  { %v55_v25 = vmul.f32 %v106_v24, %v54_v22 }
  0x37   :  { %v63_v27 = vrot.slane %v55_v25, %v62_v23  ;;  %v57_v28 = vmul.f32 %v55_v25, %v47_v14 }
  0x39   :  { %65 = vst [vmem:[#allocation5] sm:$0xff] %v63_v27  ;;  %v58_v29 = vsub.f32 %v56_v26, %v57_v28 }
  0x3a   :  { %140 = shalt.err (!%p137_p12)
}
  0x3b   :  { %s141_s15 = scalar_lea.hbm %s261_s4, 128 }
  0x3c   :  { %p142_p13 = scmp.ne.s32.totalorder %s261_s4, %s141_s15  ;;  %p145_p0 = scmp.lt.u32.totalorder %s141_s15, %s261_s4 }
  0x3e   :  { %p147_p1 = pnand %p145_p0, %p142_p13 }
  0x40   :  { %150 = shalt.err (!%p147_p1)
}
  0x41   :  { %82 = dma.vmem_to_hbm [thread:$0]  %s80_s8, 128, %s261_s4, [#allocation4]   ;;  %v70_v30 = vrot.slane %v58_v29, %v62_v23 }
  0x42   :  { %s151_s21 = scalar_lea.vmem %s90_s12, 128  ;;  %p156_p3 = scmp.lt.s32.totalorder %s90_s12, %s90_s12 }
  0x43   :  { %72 = vst [vmem:[#allocation6] sm:$0xff] %v70_v30  ;;  %p152_p2 = scmp.ne.s32.totalorder %s90_s12, %s151_s21  ;;  %p157_p4 = scmp.lt.s32.totalorder %s151_s21, %s151_s21 }
  0x45   :  { %p158_p5 = por %p157_p4, %p156_p3 }
  0x47   :  { %p159_p6 = pnand %p158_p5, %p152_p2 }
  0x49   :  { %162 = shalt.err (!%p159_p6)
}
  0x4a   :  { %s163_s24 = scalar_lea.hbm %s262_s5, 128 }
  0x4b   :  { %p164_p7 = scmp.ne.s32.totalorder %s262_s5, %s163_s24  ;;  %p167_p8 = scmp.lt.u32.totalorder %s163_s24, %s262_s5 }
  0x4d   :  { %p169_p9 = pnand %p167_p8, %p164_p7 }
  0x4f   :  { %172 = shalt.err (!%p169_p9)
}
  0x50   :  { %92 = dma.vmem_to_hbm [thread:$0]  %s90_s12, 128, %s262_s5, [#allocation7]  }
  0x51   :  { %175 = dma.done.wait [#allocation4], 128  }
  0x52   :  { %176 = vsyncadd [#allocation4], 4294967168 }
  0x53   :  { %177 = dma.done.wait [#allocation7], 128  }
  0x54   :  { %178 = vsyncadd [#allocation7], 4294967168 }
  0x55   :  { %99 = vsyncpa [#allocation3], 1 }
  0x56   :  { %100 = vsyncpa [#allocation4], 1 }
  0x57   :  { %101 = vsyncpa [#allocation7], 1 }

// kernel: graphnn_forward.5
= control target key start
LH: loop header
LB: loop body
LE: loop exit
PB: predicated region body
PF: predicated region fallthrough
CT: control target
= control target key end

     0   :  { %11 = vsyncpa [#allocation4], 0  ;;  %s1096_s0 = inlined_call_operand.hbm [shape: bf16[128,128], index: 0, kind: input, shape index: {}]   ;;  %s1097_s1 = inlined_call_operand.hbm [shape: bf16[128,128], index: 1, kind: input, shape index: {}]   ;;  %s1098_s2 = inlined_call_operand.hbm [shape: f32[1,128], index: 2, kind: input, shape index: {}]   ;;  %s1099_s3 = inlined_call_operand.hbm [shape: bf16[128,128], index: 3, kind: output, shape index: {0}]   ;;  %s1100_s4 = inlined_call_operand.hbm [shape: f32[8,128], index: 4, kind: output, shape index: {1}]   ;;  %s1101_s5 = inlined_call_operand.hbm [shape: f32[8,128], index: 5, kind: output, shape index: {2}]  }
   0x1   :  { %12 = vsyncpa [#allocation7], 0 }
   0x2   :  { %13 = vsyncpa [#allocation5], 0 }
   0x3   :  { %14 = vsyncpa [#allocation11], 0  ;;  %s970_s18 = smov [#allocation6]   ;;  %s971_s20 = smov [#allocation3]  }
   0x4   :  { %s32_s19 = sshll.u32 %s970_s18, 4  ;;  %s20_s21 = sshll.u32 %s971_s20, 4  ;;  %s33_s19 = int_to_ptr.vmem [resolvable:$true] %s32_s19  ;;  %s1008_s21 = int_to_ptr.vmem [resolvable:$true] %s20_s21 }
   0x5   :  { %s830_s24 = scalar_lea.hbm %s1097_s1, 1024 }
   0x6   :  { %p831_p0 = scmp.ne.s32.totalorder %s1097_s1, %s830_s24  ;;  %p834_p1 = scmp.lt.u32.totalorder %s830_s24, %s1097_s1 }
   0x8   :  { %p836_p2 = pnand %p834_p1, %p831_p0 }
   0xa   :  { %839 = shalt.err (!%p836_p2)
}
   0xb   :  { %s840_s29 = scalar_lea.vmem %s33_s19, 1024  ;;  %p845_p4 = scmp.lt.s32.totalorder %s33_s19, %s33_s19 }
   0xc   :  { %p841_p3 = scmp.ne.s32.totalorder %s33_s19, %s840_s29  ;;  %p846_p5 = scmp.lt.s32.totalorder %s840_s29, %s840_s29 }
   0xe   :  { %p847_p6 = por %p846_p5, %p845_p4 }
  0x10   :  { %p848_p7 = pnand %p847_p6, %p841_p3 }
  0x12   :  { %851 = shalt.err (!%p848_p7)
}
  0x13   :  { %s972_s30 = smov 64   ;;  %s973_s6 = smov 4  }
  0x14   :  { %38 = dma.hbm_to_vmem [thread:$0]  %s1097_s1, 1024, %s33_s19, [#allocation7], %s972_s30, %s972_s30, %s973_s6  }
  0x15   :  { %s852_s11 = scalar_lea.hbm %s1096_s0, 1024 }
  0x16   :  { %p853_p8 = scmp.ne.s32.totalorder %s1096_s0, %s852_s11  ;;  %p856_p9 = scmp.lt.u32.totalorder %s852_s11, %s1096_s0 }
  0x18   :  { %p858_p10 = pnand %p856_p9, %p853_p8 }
  0x1a   :  { %861 = shalt.err (!%p858_p10)
}
  0x1b   :  { %s862_s16 = scalar_lea.vmem %s1008_s21, 1024  ;;  %p867_p12 = scmp.lt.s32.totalorder %s1008_s21, %s1008_s21 }
  0x1c   :  { %p863_p11 = scmp.ne.s32.totalorder %s1008_s21, %s862_s16  ;;  %p868_p13 = scmp.lt.s32.totalorder %s862_s16, %s862_s16 }
  0x1e   :  { %p869_p0 = por %p868_p13, %p867_p12 }
  0x20   :  { %p870_p1 = pnand %p869_p0, %p863_p11 }
  0x22   :  { %873 = shalt.err (!%p870_p1)
}
  0x23   :  { %26 = dma.hbm_to_vmem [thread:$0]  %s1096_s0, 1024, %s1008_s21, [#allocation4], %s972_s30, %s972_s30, %s973_s6  }
  0x24   :  { %s974_s18 = smov [#allocation8]   ;;  %s874_s23 = scalar_lea.hbm %s1098_s2, 16 }
  0x25   :  { %s45_s19 = sshll.u32 %s974_s18, 4  ;;  %p875_p2 = scmp.ne.s32.totalorder %s1098_s2, %s874_s23  ;;  %s46_s19 = int_to_ptr.vmem [resolvable:$true] %s45_s19 }
  0x26   :  { %p878_p3 = scmp.lt.u32.totalorder %s874_s23, %s1098_s2 }
  0x28   :  { %p880_p4 = pnand %p878_p3, %p875_p2 }
  0x2a   :  { %883 = shalt.err (!%p880_p4)
}
  0x2b   :  { %s884_s28 = scalar_lea.vmem %s46_s19, 16  ;;  %s888_s0 = scalar_lea.vmem %s46_s19, 32 }
  0x2c   :  { %p885_p5 = scmp.ne.s32.totalorder %s46_s19, %s884_s28  ;;  %p889_p6 = scmp.lt.s32.totalorder %s46_s19, %s46_s19 }
  0x2d   :  { %p890_p7 = scmp.lt.s32.totalorder %s888_s0, %s884_s28 }
  0x2f   :  { %p891_p8 = por %p890_p7, %p889_p6 }
  0x31   :  { %p892_p9 = pnand %p891_p8, %p885_p5 }
  0x33   :  { %895 = shalt.err (!%p892_p9)
}
  0x34   :  { %48 = dma.hbm_to_vmem [thread:$0]  %s1098_s2, 16, %s46_s19, [#allocation7]  }
  0x35   :  { %962 = dma.done.wait [#allocation4], 1024  }
  0x36   :  { %963 = vsyncadd [#allocation4], 4294966272 }
  0x37   :  { %964 = dma.done.wait [#allocation7], 1040  }
  0x38   :  { %965 = vsyncadd [#allocation7], 4294966256  ;;  %v814_v0 = vld [vmem:[#allocation6] sm:$0xff]   ;;  %v815_v1 = vld [vmem:[#allocation6 + $0x8] sm:$0xff]   ;;  %s975_s2 = smov [#allocation9]  }
  0x39   :  { %758 = vmatprep.subr.bf16.mxu0 %v814_v0  ;;  %790 = vmatprep.subr.bf16.mxu1 %v814_v0  ;;  %v816_v2 = vld [vmem:[#allocation6 + $0x10] sm:$0xff]   ;;  %v817_v3 = vld [vmem:[#allocation6 + $0x18] sm:$0xff]   ;;  %v822_v4 = vld [vmem:[#allocation3] sm:$0xff]   ;;  %s606_s7 = sshll.u32 %s975_s2, 4  ;;  %s607_s7 = int_to_ptr.vmem [resolvable:$true] %s606_s7 }
  0x3a   :  { %759 = vmatpush3.bf16.msra.mxu0 %v814_v0  ;;  %798 = vmatpush3.bf16.msra.mxu1 %v814_v0  ;;  %v818_v5 = vld [vmem:[#allocation6 + $0x20] sm:$0xff]   ;;  %v819_v7 = vld [vmem:[#allocation6 + $0x28] sm:$0xff]   ;;  %v820_v8 = vld [vmem:[#allocation6 + $0x30] sm:$0xff]   ;;  %s896_s8 = scalar_lea.vmem %s607_s7, 1024  ;;  %p901_p11 = scmp.lt.s32.totalorder %s607_s7, %s607_s7 }
  0x3b   :  { %760 = vmatprep.subr.bf16.mxu0 %v815_v1  ;;  %791 = vmatprep.subr.bf16.mxu1 %v815_v1  ;;  %v826_v6 = vld [vmem:[#allocation3 + $0x20] sm:$0xff]   ;;  %v821_v9 = vld [vmem:[#allocation6 + $0x38] sm:$0xff]   ;;  %v823_v10 = vld [vmem:[#allocation3 + $0x8] sm:$0xff]   ;;  %p897_p10 = scmp.ne.s32.totalorder %s607_s7, %s896_s8  ;;  %p902_p12 = scmp.lt.s32.totalorder %s896_s8, %s896_s8 }
  0x3c   :  { %774 = vmatprep.mubr.bf16.mxu0 %v822_v4  ;;  %782 = vmatprep.mubr.bf16.mxu1 %v826_v6  ;;  %v827_v11 = vld [vmem:[#allocation3 + $0x28] sm:$0xff]   ;;  %v824_v12 = vld [vmem:[#allocation3 + $0x10] sm:$0xff]   ;;  %v825_v14 = vld [vmem:[#allocation3 + $0x18] sm:$0xff]  }
  0x3d   :  { %v828_v13 = vld [vmem:[#allocation3 + $0x30] sm:$0xff]   ;;  %v829_v15 = vld [vmem:[#allocation3 + $0x38] sm:$0xff]   ;;  %v662_v16 = vld [vmem:[#allocation8] ss:$0 sm:$0xff]  ;;  %p903_p13 = por %p902_p12, %p901_p11 }
  0x3e   :  { %761 = vmatpush3.bf16.msra.mxu0 %v815_v1  ;;  %799 = vmatpush3.bf16.msra.mxu1 %v815_v1 }
  0x3f   :  { %762 = vmatprep.subr.bf16.mxu0 %v816_v2  ;;  %792 = vmatprep.subr.bf16.mxu1 %v816_v2  ;;  %p904_p0 = pnand %p903_p13, %p897_p10 }
  0x42   :  { %763 = vmatpush3.bf16.msra.mxu0 %v816_v2  ;;  %800 = vmatpush3.bf16.msra.mxu1 %v816_v2 }
  0x43   :  { %764 = vmatprep.subr.bf16.mxu0 %v817_v3  ;;  %793 = vmatprep.subr.bf16.mxu1 %v817_v3 }
  0x46   :  { %765 = vmatpush3.bf16.msra.mxu0 %v817_v3  ;;  %801 = vmatpush3.bf16.msra.mxu1 %v817_v3 }
  0x47   :  { %766 = vmatprep.subr.bf16.mxu0 %v818_v5  ;;  %794 = vmatprep.subr.bf16.mxu1 %v818_v5 }
  0x4a   :  { %767 = vmatpush3.bf16.msra.mxu0 %v818_v5  ;;  %802 = vmatpush3.bf16.msra.mxu1 %v818_v5 }
  0x4b   :  { %768 = vmatprep.subr.bf16.mxu0 %v819_v7  ;;  %795 = vmatprep.subr.bf16.mxu1 %v819_v7 }
  0x4e   :  { %769 = vmatpush3.bf16.msra.mxu0 %v819_v7  ;;  %803 = vmatpush3.bf16.msra.mxu1 %v819_v7 }
  0x4f   :  { %770 = vmatprep.subr.bf16.mxu0 %v820_v8  ;;  %796 = vmatprep.subr.bf16.mxu1 %v820_v8 }
  0x52   :  { %771 = vmatpush3.bf16.msra.mxu0 %v820_v8  ;;  %804 = vmatpush3.bf16.msra.mxu1 %v820_v8 }
  0x53   :  { %772 = vmatprep.subr.bf16.mxu0 %v821_v9  ;;  %797 = vmatprep.subr.bf16.mxu1 %v821_v9 }
  0x56   :  { %773 = vmatpush3.bf16.msra.mxu0 %v821_v9  ;;  %805 = vmatpush3.bf16.msra.mxu1 %v821_v9 }
  0x59   :  { %775 = vmatmul.mubr.bf16.vlgmr.msra.gmra.mrb[0].mxu0 %v823_v10  ;;  %783 = vmatmul.mubr.bf16.vlgmr.msra.gmra.mrb[0].mxu1 %v827_v11 }
  0x5a   :  { %778 = vmatprep.mubr.bf16.mxu0 %v824_v12  ;;  %786 = vmatprep.mubr.bf16.mxu1 %v828_v13 }
  0x61   :  { %779 = vmatmul.mubr.bf16.gmra.mrb[4].mxu0 %v825_v14  ;;  %787 = vmatmul.mubr.bf16.gmra.mrb[4].mxu1 %v829_v15 }
 0x12c   :  { %v776_v17 = vpop.f32.mrb[0].mxu0  ;;  %v784_v18 = vpop.f32.mrb[0].mxu1 }
 0x12d   :  { %v257_v19 = vpop.f32.mrb[1].mxu0  ;;  %v388_v20 = vadd.f32 %v784_v18, %v662_v16  ;;  %v289_v21 = vpop.f32.mrb[1].mxu1  ;;  %v380_v26 = vadd.f32 %v776_v17, %v662_v16 }
 0x12e   :  { %v378_v22 = vadd.f32 %v662_v16, %v257_v19  ;;  %v777_v23 = vpop.f32.mrb[2].mxu0  ;;  %v386_v24 = vadd.f32 %v662_v16, %v289_v21  ;;  %v785_v25 = vpop.f32.mrb[2].mxu1 }
 0x12f   :  { %v381_v27 = vadd.f32 %v777_v23, %v662_v16  ;;  %v260_v28 = vpop.f32.mrb[3].mxu0  ;;  %v389_v29 = vadd.f32 %v785_v25, %v662_v16  ;;  %v292_v30 = vpop.f32.mrb[3].mxu1  ;;  %v564_v40 = vmul.f32 %v380_v26, %v380_v26 }
 0x130   :  { %v379_v31 = vadd.f32 %v662_v16, %v260_v28  ;;  %v387_v32 = vadd.f32 %v662_v16, %v292_v30  ;;  %v562_v33 = vmul.f32 %v378_v22, %v378_v22 }
 0x131   :  { %v703_v34 = vpack.c.bf16 %v381_v27, %v380_v26  ;;  %v723_v35 = vpack.c.bf16 %v389_v29, %v388_v20  ;;  %v565_v48 = vmul.f32 %v381_v27, %v381_v27 }
 0x132   :  { %v698_v36 = vpack.c.bf16 %v379_v31, %v378_v22  ;;  %v541_v37 = vadd.f32 %v379_v31, %v378_v22  ;;  %v563_v38 = vmul.f32 %v379_v31, %v379_v31  ;;  %v718_v39 = vpack.c.bf16 %v387_v32, %v386_v24 }
 0x133   :  { %735 = vst [vmem:[#allocation9 + $0x8] sm:$0xff] %v703_v34   ;;  %739 = vst [vmem:[#allocation9 + $0x28] sm:$0xff] %v723_v35  }
 0x134   :  { %699 = vst [vmem:[#allocation9] sm:$0xff] %v698_v36   ;;  %v542_v41 = vadd.f32 %v541_v37, %v380_v26  ;;  %v578_v42 = vadd.f32 %v563_v38, %v562_v33  ;;  %v780_v43 = vpop.f32.mrb[4].mxu0  ;;  %738 = vst [vmem:[#allocation9 + $0x20] sm:$0xff] %v718_v39   ;;  %v788_v44 = vpop.f32.mrb[4].mxu1 }
 0x135   :  { %v273_v45 = vpop.f32.mrb[5].mxu0  ;;  %v392_v46 = vadd.f32 %v788_v44, %v662_v16  ;;  %v305_v47 = vpop.f32.mrb[5].mxu1  ;;  %v384_v54 = vadd.f32 %v780_v43, %v662_v16 }
 0x136   :  { %v579_v49 = vadd.f32 %v578_v42, %v564_v40  ;;  %v382_v50 = vadd.f32 %v662_v16, %v273_v45  ;;  %v543_v51 = vadd.f32 %v542_v41, %v381_v27  ;;  %v781_v52 = vpop.f32.mrb[6].mxu0  ;;  %v789_v53 = vpop.f32.mrb[6].mxu1  ;;  %v390_v57 = vadd.f32 %v662_v16, %v305_v47 }
 0x137   :  { %v385_v55 = vadd.f32 %v781_v52, %v662_v16  ;;  %v276_v56 = vpop.f32.mrb[7].mxu0  ;;  %v393_v58 = vadd.f32 %v789_v53, %v662_v16  ;;  %v308_v59 = vpop.f32.mrb[7].mxu1  ;;  %v568_v8 = vmul.f32 %v384_v54, %v384_v54 }
 0x138   :  { %v544_v60 = vadd.f32 %v543_v51, %v382_v50  ;;  %v566_v61 = vmul.f32 %v382_v50, %v382_v50  ;;  %v580_v62 = vadd.f32 %v579_v49, %v565_v48  ;;  %v383_v63 = vadd.f32 %v662_v16, %v276_v56 }
 0x139   :  { %v713_v0 = vpack.c.bf16 %v385_v55, %v384_v54  ;;  %v733_v1 = vpack.c.bf16 %v393_v58, %v392_v46  ;;  %v391_v2 = vadd.f32 %v662_v16, %v308_v59  ;;  %v569_v11 = vmul.f32 %v385_v55, %v385_v55 }
 0x13a   :  { %v581_v3 = vadd.f32 %v580_v62, %v566_v61  ;;  %v708_v4 = vpack.c.bf16 %v383_v63, %v382_v50  ;;  %v545_v5 = vadd.f32 %v544_v60, %v383_v63  ;;  %v567_v6 = vmul.f32 %v383_v63, %v383_v63 }
 0x13b   :  { %737 = vst [vmem:[#allocation9 + $0x18] sm:$0xff] %v713_v0   ;;  %741 = vst [vmem:[#allocation9 + $0x38] sm:$0xff] %v733_v1   ;;  %v728_v7 = vpack.c.bf16 %v391_v2, %v390_v57 }
 0x13c   :  { %736 = vst [vmem:[#allocation9 + $0x10] sm:$0xff] %v708_v4   ;;  %v546_v9 = vadd.f32 %v545_v5, %v384_v54  ;;  %v582_v10 = vadd.f32 %v581_v3, %v567_v6 }
 0x13d   :  { %740 = vst [vmem:[#allocation9 + $0x30] sm:$0xff] %v728_v7  }
 0x13e   :  { %v547_v12 = vadd.f32 %v546_v9, %v385_v55  ;;  %v583_v13 = vadd.f32 %v582_v10, %v568_v8 }
 0x13f   :  { %907 = shalt.err (!%p904_p0)
}
 0x140   :  { %s908_s11 = scalar_lea.hbm %s1099_s3, 1024 }
 0x141   :  { %p909_p1 = scmp.ne.s32.totalorder %s1099_s3, %s908_s11  ;;  %p912_p2 = scmp.lt.u32.totalorder %s908_s11, %s1099_s3 }
 0x143   :  { %p914_p3 = pnand %p912_p2, %p909_p1 }
 0x145   :  { %917 = shalt.err (!%p914_p3)
}
 0x146   :  { %612 = dma.vmem_to_hbm [thread:$0]  %s607_s7, 1024, %s1099_s3, [#allocation5], %s972_s30, %s972_s30, %s973_s6   ;;  %v584_v14 = vadd.f32 %v583_v13, %v569_v11  ;;  %v556_v15 = vrot.slane %v547_v12, 4 }
 0x147   :  { %s976_s17 = smov [#allocation10]   ;;  %s977_s19 = smov [#allocation12]  }
 0x148   :  { %v557_v16 = vadd.f32 %v556_v15, %v547_v12  ;;  %v593_v17 = vrot.slane %v584_v14, 4  ;;  %s619_s18 = sshll.u32 %s976_s17, 4  ;;  %s629_s20 = sshll.u32 %s977_s19, 4  ;;  %s620_s18 = int_to_ptr.vmem [resolvable:$true] %s619_s18  ;;  %s630_s20 = int_to_ptr.vmem [resolvable:$true] %s629_s20 }
 0x149   :  { %s918_s3 = scalar_lea.vmem %s620_s18, 128  ;;  %p923_p5 = scmp.lt.s32.totalorder %s620_s18, %s620_s18 }
 0x14a   :  { %v558_v18 = vrot.slane %v557_v16, 2  ;;  %v594_v19 = vadd.f32 %v593_v17, %v584_v14  ;;  %p919_p4 = scmp.ne.s32.totalorder %s620_s18, %s918_s3  ;;  %p924_p6 = scmp.lt.s32.totalorder %s918_s3, %s918_s3 }
 0x14c   :  { %v559_v20 = vadd.f32 %v558_v18, %v557_v16  ;;  %v595_v21 = vrot.slane %v594_v19, 2  ;;  %p925_p7 = por %p924_p6, %p923_p5 }
 0x14e   :  { %v560_v22 = vrot.slane %v559_v20, 1  ;;  %v596_v23 = vadd.f32 %v595_v21, %v594_v19  ;;  %p926_p8 = pnand %p925_p7, %p919_p4 }
 0x150   :  { %v561_v24 = vadd.f32 %v560_v22, %v559_v20  ;;  %v597_v25 = vrot.slane %v596_v23, 1 }
 0x152   :  { %599 = vst [vmem:[#allocation10] sm:$0xff] %v561_v24  ;;  %v598_v26 = vadd.f32 %v597_v25, %v596_v23 }
 0x153   :  { %929 = shalt.err (!%p926_p8)
}
 0x154   :  { %s930_s22 = scalar_lea.hbm %s1100_s4, 128 }
 0x155   :  { %p931_p9 = scmp.ne.s32.totalorder %s1100_s4, %s930_s22  ;;  %p934_p10 = scmp.lt.u32.totalorder %s930_s22, %s1100_s4 }
 0x157   :  { %p936_p11 = pnand %p934_p10, %p931_p9 }
 0x159   :  { %939 = shalt.err (!%p936_p11)
}
 0x15a   :  { %622 = dma.vmem_to_hbm [thread:$0]  %s620_s18, 128, %s1100_s4, [#allocation11]   ;;  %600 = vst [vmem:[#allocation12] sm:$0xff] %v598_v26 }
 0x15b   :  { %s940_s0 = scalar_lea.vmem %s630_s20, 128  ;;  %p945_p13 = scmp.lt.s32.totalorder %s630_s20, %s630_s20 }
 0x15c   :  { %p941_p12 = scmp.ne.s32.totalorder %s630_s20, %s940_s0  ;;  %p946_p0 = scmp.lt.s32.totalorder %s940_s0, %s940_s0 }
 0x15e   :  { %p947_p1 = por %p946_p0, %p945_p13 }
 0x160   :  { %p948_p2 = pnand %p947_p1, %p941_p12 }
 0x162   :  { %951 = shalt.err (!%p948_p2)
}
 0x163   :  { %s952_s2 = scalar_lea.hbm %s1101_s5, 128 }
 0x164   :  { %p953_p3 = scmp.ne.s32.totalorder %s1101_s5, %s952_s2  ;;  %p956_p4 = scmp.lt.u32.totalorder %s952_s2, %s1101_s5 }
 0x166   :  { %p958_p5 = pnand %p956_p4, %p953_p3 }
 0x168   :  { %961 = shalt.err (!%p958_p5)
}
 0x169   :  { %632 = dma.vmem_to_hbm [thread:$0]  %s630_s20, 128, %s1101_s5, [#allocation11]  }
 0x16a   :  { %966 = dma.done.wait [#allocation5], 1024  }
 0x16b   :  { %967 = vsyncadd [#allocation5], 4294966272 }
 0x16c   :  { %968 = dma.done.wait [#allocation11], 256  }
 0x16d   :  { %969 = vsyncadd [#allocation11], 4294967040 }
 0x16e   :  { %642 = vsyncpa [#allocation4], 1 }
 0x16f   :  { %643 = vsyncpa [#allocation7], 1 }
 0x170   :  { %644 = vsyncpa [#allocation5], 1 }
 0x171   :  { %645 = vsyncpa [#allocation11], 1 }

// kernel: graphnn_forward.4
= control target key start
LH: loop header
LB: loop body
LE: loop exit
PB: predicated region body
PF: predicated region fallthrough
CT: control target
= control target key end

     0   :  { %11 = vsyncpa [#allocation4], 0  ;;  %s1612_s0 = inlined_call_operand.hbm [shape: bf16[128,128], index: 0, kind: input, shape index: {}]   ;;  %s1613_s1 = inlined_call_operand.hbm [shape: bf16[128,128], index: 1, kind: input, shape index: {}]   ;;  %s1614_s2 = inlined_call_operand.hbm [shape: bf16[128,128], index: 2, kind: input, shape index: {}]   ;;  %s1615_s3 = inlined_call_operand.hbm [shape: f32[1,128], index: 3, kind: input, shape index: {}]   ;;  %s1616_s4 = inlined_call_operand.hbm [shape: bf16[128,128], index: 4, kind: input, shape index: {}]   ;;  %s1617_s5 = inlined_call_operand.hbm [shape: bf16[128,128], index: 5, kind: input, shape index: {}]   ;;  %s1618_s6 = inlined_call_operand.hbm [shape: bf16[128,128], index: 6, kind: output, shape index: {}]  }
   0x1   :  { %12 = vsyncpa [#allocation7], 0 }
   0x2   :  { %13 = vsyncpa [#allocation10], 0 }
   0x3   :  { %14 = vsyncpa [#allocation13], 0 }
   0x4   :  { %15 = vsyncpa [#allocation5], 0  ;;  %s1426_s21 = smov [#allocation6]   ;;  %s1427_s23 = smov [#allocation9]  }
   0x5   :  { %s33_s22 = sshll.u32 %s1426_s21, 4  ;;  %s58_s24 = sshll.u32 %s1427_s23, 4  ;;  %s34_s22 = int_to_ptr.vmem [resolvable:$true] %s33_s22  ;;  %s1470_s24 = int_to_ptr.vmem [resolvable:$true] %s58_s24 }
   0x6   :  { %s1262_s27 = scalar_lea.hbm %s1613_s1, 1024 }
   0x7   :  { %p1263_p0 = scmp.ne.s32.totalorder %s1613_s1, %s1262_s27  ;;  %p1266_p1 = scmp.lt.u32.totalorder %s1262_s27, %s1613_s1 }
   0x9   :  { %p1268_p2 = pnand %p1266_p1, %p1263_p0 }
   0xb   :  { %1271 = shalt.err (!%p1268_p2)
}
   0xc   :  { %s1272_s8 = scalar_lea.vmem %s34_s22, 1024  ;;  %p1277_p4 = scmp.lt.s32.totalorder %s34_s22, %s34_s22 }
   0xd   :  { %p1273_p3 = scmp.ne.s32.totalorder %s34_s22, %s1272_s8  ;;  %p1278_p5 = scmp.lt.s32.totalorder %s1272_s8, %s1272_s8 }
   0xf   :  { %p1279_p6 = por %p1278_p5, %p1277_p4 }
  0x11   :  { %p1280_p7 = pnand %p1279_p6, %p1273_p3 }
  0x13   :  { %1283 = shalt.err (!%p1280_p7)
}
  0x14   :  { %s1428_s9 = smov 64   ;;  %s1429_s10 = smov 4  }
  0x15   :  { %39 = dma.hbm_to_vmem [thread:$0]  %s1613_s1, 1024, %s34_s22, [#allocation7], %s1428_s9, %s1428_s9, %s1429_s10  }
  0x16   :  { %s1284_s15 = scalar_lea.hbm %s1615_s3, 16 }
  0x17   :  { %p1285_p8 = scmp.ne.s32.totalorder %s1615_s3, %s1284_s15  ;;  %p1288_p9 = scmp.lt.u32.totalorder %s1284_s15, %s1615_s3 }
  0x19   :  { %p1290_p10 = pnand %p1288_p9, %p1285_p8 }
  0x1b   :  { %1293 = shalt.err (!%p1290_p10)
}
  0x1c   :  { %s1294_s20 = scalar_lea.vmem %s1470_s24, 16  ;;  %s1298_s1 = scalar_lea.vmem %s1470_s24, 32 }
  0x1d   :  { %p1295_p11 = scmp.ne.s32.totalorder %s1470_s24, %s1294_s20  ;;  %p1299_p12 = scmp.lt.s32.totalorder %s1470_s24, %s1470_s24 }
  0x1e   :  { %p1300_p13 = scmp.lt.s32.totalorder %s1298_s1, %s1294_s20 }
  0x20   :  { %p1301_p0 = por %p1300_p13, %p1299_p12 }
  0x22   :  { %p1302_p1 = pnand %p1301_p0, %p1295_p11 }
  0x24   :  { %1305 = shalt.err (!%p1302_p1)
}
  0x25   :  { %61 = dma.hbm_to_vmem [thread:$0]  %s1615_s3, 16, %s1470_s24, [#allocation10]  }
  0x26   :  { %s1430_s23 = smov [#allocation3]   ;;  %s1431_s26 = smov [#allocation8]  }
  0x27   :  { %s21_s25 = sshll.u32 %s1430_s23, 4  ;;  %s45_s27 = sshll.u32 %s1431_s26, 4  ;;  %s22_s25 = int_to_ptr.vmem [resolvable:$true] %s21_s25  ;;  %s1505_s27 = int_to_ptr.vmem [resolvable:$true] %s45_s27 }
  0x28   :  { %s1306_s30 = scalar_lea.hbm %s1612_s0, 1024 }
  0x29   :  { %p1307_p2 = scmp.ne.s32.totalorder %s1612_s0, %s1306_s30  ;;  %p1310_p3 = scmp.lt.u32.totalorder %s1306_s30, %s1612_s0 }
  0x2b   :  { %p1312_p4 = pnand %p1310_p3, %p1307_p2 }
  0x2d   :  { %1315 = shalt.err (!%p1312_p4)
}
  0x2e   :  { %s1316_s3 = scalar_lea.vmem %s22_s25, 1024  ;;  %p1321_p6 = scmp.lt.s32.totalorder %s22_s25, %s22_s25 }
  0x2f   :  { %p1317_p5 = scmp.ne.s32.totalorder %s22_s25, %s1316_s3  ;;  %p1322_p7 = scmp.lt.s32.totalorder %s1316_s3, %s1316_s3 }
  0x31   :  { %p1323_p8 = por %p1322_p7, %p1321_p6 }
  0x33   :  { %p1324_p9 = pnand %p1323_p8, %p1317_p5 }
  0x35   :  { %1327 = shalt.err (!%p1324_p9)
}
  0x36   :  { %27 = dma.hbm_to_vmem [thread:$0]  %s1612_s0, 1024, %s22_s25, [#allocation4], %s1428_s9, %s1428_s9, %s1429_s10  }
  0x37   :  { %s1328_s16 = scalar_lea.hbm %s1614_s2, 1024 }
  0x38   :  { %p1329_p10 = scmp.ne.s32.totalorder %s1614_s2, %s1328_s16  ;;  %p1332_p11 = scmp.lt.u32.totalorder %s1328_s16, %s1614_s2 }
  0x3a   :  { %p1334_p12 = pnand %p1332_p11, %p1329_p10 }
  0x3c   :  { %1337 = shalt.err (!%p1334_p12)
}
  0x3d   :  { %s1338_s1 = scalar_lea.vmem %s1505_s27, 1024  ;;  %p1343_p0 = scmp.lt.s32.totalorder %s1505_s27, %s1505_s27 }
  0x3e   :  { %p1339_p13 = scmp.ne.s32.totalorder %s1505_s27, %s1338_s1  ;;  %p1344_p1 = scmp.lt.s32.totalorder %s1338_s1, %s1338_s1 }
  0x40   :  { %p1345_p2 = por %p1344_p1, %p1343_p0 }
  0x42   :  { %p1346_p3 = pnand %p1345_p2, %p1339_p13 }
  0x44   :  { %1349 = shalt.err (!%p1346_p3)
}
  0x45   :  { %51 = dma.hbm_to_vmem [thread:$0]  %s1614_s2, 1024, %s1505_s27, [#allocation7], %s1428_s9, %s1428_s9, %s1429_s10  }
  0x46   :  { %s1432_s22 = smov [#allocation11]   ;;  %s1433_s25 = smov [#allocation12]  }
  0x47   :  { %s67_s23 = sshll.u32 %s1432_s22, 4  ;;  %s79_s26 = sshll.u32 %s1433_s25, 4  ;;  %s68_s23 = int_to_ptr.vmem [resolvable:$true] %s67_s23  ;;  %s1542_s26 = int_to_ptr.vmem [resolvable:$true] %s79_s26 }
  0x48   :  { %s1350_s30 = scalar_lea.hbm %s1616_s4, 1024 }
  0x49   :  { %p1351_p4 = scmp.ne.s32.totalorder %s1616_s4, %s1350_s30  ;;  %p1354_p5 = scmp.lt.u32.totalorder %s1350_s30, %s1616_s4 }
  0x4b   :  { %p1356_p6 = pnand %p1354_p5, %p1351_p4 }
  0x4d   :  { %1359 = shalt.err (!%p1356_p6)
}
  0x4e   :  { %s1360_s2 = scalar_lea.vmem %s68_s23, 1024  ;;  %p1365_p8 = scmp.lt.s32.totalorder %s68_s23, %s68_s23 }
  0x4f   :  { %p1361_p7 = scmp.ne.s32.totalorder %s68_s23, %s1360_s2  ;;  %p1366_p9 = scmp.lt.s32.totalorder %s1360_s2, %s1360_s2 }
  0x51   :  { %p1367_p10 = por %p1366_p9, %p1365_p8 }
  0x53   :  { %p1368_p11 = pnand %p1367_p10, %p1361_p7 }
  0x55   :  { %1371 = shalt.err (!%p1368_p11)
}
  0x56   :  { %73 = dma.hbm_to_vmem [thread:$0]  %s1616_s4, 1024, %s68_s23, [#allocation10], %s1428_s9, %s1428_s9, %s1429_s10  }
  0x57   :  { %s1372_s14 = scalar_lea.hbm %s1617_s5, 1024 }
  0x58   :  { %p1373_p12 = scmp.ne.s32.totalorder %s1617_s5, %s1372_s14  ;;  %p1376_p13 = scmp.lt.u32.totalorder %s1372_s14, %s1617_s5 }
  0x5a   :  { %p1378_p0 = pnand %p1376_p13, %p1373_p12 }
  0x5c   :  { %1381 = shalt.err (!%p1378_p0)
}
  0x5d   :  { %s1382_s19 = scalar_lea.vmem %s1542_s26, 1024  ;;  %p1387_p2 = scmp.lt.s32.totalorder %s1542_s26, %s1542_s26 }
  0x5e   :  { %p1383_p1 = scmp.ne.s32.totalorder %s1542_s26, %s1382_s19  ;;  %p1388_p3 = scmp.lt.s32.totalorder %s1382_s19, %s1382_s19 }
  0x60   :  { %p1389_p4 = por %p1388_p3, %p1387_p2 }
  0x62   :  { %p1390_p5 = pnand %p1389_p4, %p1383_p1 }
  0x64   :  { %1393 = shalt.err (!%p1390_p5)
}
  0x65   :  { %85 = dma.hbm_to_vmem [thread:$0]  %s1617_s5, 1024, %s1542_s26, [#allocation13], %s1428_s9, %s1428_s9, %s1429_s10  }
  0x66   :  { %1416 = dma.done.wait [#allocation4], 1024  }
  0x67   :  { %1417 = vsyncadd [#allocation4], 4294966272 }
  0x68   :  { %1418 = dma.done.wait [#allocation7], 2048  }
  0x69   :  { %1419 = vsyncadd [#allocation7], 4294965248 }
  0x6a   :  { %1420 = dma.done.wait [#allocation10], 1040  }
  0x6b   :  { %1421 = vsyncadd [#allocation10], 4294966256 }
  0x6c   :  { %1422 = dma.done.wait [#allocation13], 1024  }
  0x6d   :  { %1423 = vsyncadd [#allocation13], 4294966272  ;;  %v1230_v0 = vld [vmem:[#allocation6] sm:$0xff]   ;;  %v1231_v1 = vld [vmem:[#allocation6 + $0x8] sm:$0xff]   ;;  %s1434_s5 = smov [#allocation14]  }
  0x6e   :  { %1109 = vmatprep.subr.bf16.mxu0 %v1230_v0  ;;  %v1232_v2 = vld [vmem:[#allocation6 + $0x10] sm:$0xff]   ;;  %v1233_v3 = vld [vmem:[#allocation6 + $0x18] sm:$0xff]   ;;  %v1238_v4 = vld [vmem:[#allocation3] sm:$0xff]   ;;  %s895_s1 = sshll.u32 %s1434_s5, 4  ;;  %s896_s1 = int_to_ptr.vmem [resolvable:$true] %s895_s1 }
  0x6f   :  { %1110 = vmatpush3.bf16.msra.mxu0 %v1230_v0  ;;  %1125 = vmatprep.mubr.bf16.mxu0 %v1238_v4  ;;  %v1234_v5 = vld [vmem:[#allocation6 + $0x20] sm:$0xff]   ;;  %v1235_v6 = vld [vmem:[#allocation6 + $0x28] sm:$0xff]   ;;  %v1236_v9 = vld [vmem:[#allocation6 + $0x30] sm:$0xff]   ;;  %s1394_s0 = scalar_lea.vmem %s896_s1, 1024  ;;  %p1399_p7 = scmp.lt.s32.totalorder %s896_s1, %s896_s1 }
  0x70   :  { %1111 = vmatprep.subr.bf16.mxu0 %v1231_v1  ;;  %v1246_v7 = vld [vmem:[#allocation8] sm:$0xff]   ;;  %v1247_v8 = vld [vmem:[#allocation8 + $0x8] sm:$0xff]   ;;  %v1248_v10 = vld [vmem:[#allocation8 + $0x10] sm:$0xff]   ;;  %p1395_p6 = scmp.ne.s32.totalorder %s896_s1, %s1394_s0  ;;  %p1400_p8 = scmp.lt.s32.totalorder %s1394_s0, %s1394_s0 }
  0x71   :  { %1141 = vmatprep.subr.bf16.mxu1 %v1246_v7  ;;  %v1237_v11 = vld [vmem:[#allocation6 + $0x38] sm:$0xff]   ;;  %v1250_v13 = vld [vmem:[#allocation8 + $0x20] sm:$0xff]   ;;  %v1239_v14 = vld [vmem:[#allocation3 + $0x8] sm:$0xff]  }
  0x72   :  { %1142 = vmatpush3.bf16.msra.mxu1 %v1246_v7  ;;  %v1249_v12 = vld [vmem:[#allocation8 + $0x18] sm:$0xff]   ;;  %v1240_v15 = vld [vmem:[#allocation3 + $0x10] sm:$0xff]   ;;  %v1251_v16 = vld [vmem:[#allocation8 + $0x28] sm:$0xff]   ;;  %p1401_p9 = por %p1400_p8, %p1399_p7 }
  0x73   :  { %1112 = vmatpush3.bf16.msra.mxu0 %v1231_v1  ;;  %1143 = vmatprep.subr.bf16.mxu1 %v1247_v8  ;;  %v1252_v17 = vld [vmem:[#allocation8 + $0x30] sm:$0xff]   ;;  %v1241_v18 = vld [vmem:[#allocation3 + $0x18] sm:$0xff]   ;;  %v1242_v19 = vld [vmem:[#allocation3 + $0x20] sm:$0xff]  }
  0x74   :  { %1113 = vmatprep.subr.bf16.mxu0 %v1232_v2  ;;  %v1243_v20 = vld [vmem:[#allocation3 + $0x28] sm:$0xff]   ;;  %v1244_v21 = vld [vmem:[#allocation3 + $0x30] sm:$0xff]   ;;  %v1245_v22 = vld [vmem:[#allocation3 + $0x38] sm:$0xff]   ;;  %p1402_p10 = pnand %p1401_p9, %p1395_p6 }
  0x75   :  { %v1253_v23 = vld [vmem:[#allocation8 + $0x38] sm:$0xff]   ;;  %v1254_v24 = vld [vmem:[#allocation12] sm:$0xff]   ;;  %v1255_v25 = vld [vmem:[#allocation12 + $0x8] sm:$0xff]  }
  0x76   :  { %1144 = vmatpush3.bf16.msra.mxu1 %v1247_v8  ;;  %v1256_v26 = vld [vmem:[#allocation12 + $0x10] sm:$0xff]   ;;  %v1257_v27 = vld [vmem:[#allocation12 + $0x18] sm:$0xff]   ;;  %v1258_v28 = vld [vmem:[#allocation12 + $0x20] sm:$0xff]  }
  0x77   :  { %1114 = vmatpush3.bf16.msra.mxu0 %v1232_v2  ;;  %1145 = vmatprep.subr.bf16.mxu1 %v1248_v10  ;;  %v1259_v29 = vld [vmem:[#allocation12 + $0x28] sm:$0xff]   ;;  %v1260_v54 = vld [vmem:[#allocation12 + $0x30] sm:$0xff]   ;;  %v1261_v55 = vld [vmem:[#allocation12 + $0x38] sm:$0xff]  }
  0x78   :  { %1115 = vmatprep.subr.bf16.mxu0 %v1233_v3  ;;  %v1579_v56 = vld [vmem:[#allocation9] ss:$0 sm:$0xff]  ;;  %v1047_v57 = vld [vmem:[#allocation11 + $0x8] sm:$0xff]   ;;  %v976_v58 = vld [vmem:[#allocation11] sm:$0xff]  }
  0x79   :  { %v981_v61 = vunpack.c.l.bf16 %v1047_v57  ;;  %v982_v63 = vunpack.c.h.bf16 %v1047_v57  ;;  %v977_v1 = vunpack.c.l.bf16 %v976_v58 }
  0x7a   :  { %1146 = vmatpush3.bf16.msra.mxu1 %v1248_v10 }
  0x7b   :  { %1116 = vmatpush3.bf16.msra.mxu0 %v1233_v3  ;;  %1147 = vmatprep.subr.bf16.mxu1 %v1249_v12  ;;  %v978_v3 = vunpack.c.h.bf16 %v976_v58 }
  0x7c   :  { %1117 = vmatprep.subr.bf16.mxu0 %v1234_v5 }
  0x7e   :  { %1148 = vmatpush3.bf16.msra.mxu1 %v1249_v12 }
  0x7f   :  { %1118 = vmatpush3.bf16.msra.mxu0 %v1234_v5  ;;  %1149 = vmatprep.subr.bf16.mxu1 %v1250_v13 }
  0x80   :  { %1119 = vmatprep.subr.bf16.mxu0 %v1235_v6 }
  0x82   :  { %1150 = vmatpush3.bf16.msra.mxu1 %v1250_v13  ;;  %v1048_v13 = vld [vmem:[#allocation11 + $0x10] sm:$0xff]  }
  0x83   :  { %1120 = vmatpush3.bf16.msra.mxu0 %v1235_v6  ;;  %1151 = vmatprep.subr.bf16.mxu1 %v1251_v16 }
  0x84   :  { %1121 = vmatprep.subr.bf16.mxu0 %v1236_v9 }
  0x86   :  { %1152 = vmatpush3.bf16.msra.mxu1 %v1251_v16 }
  0x87   :  { %1122 = vmatpush3.bf16.msra.mxu0 %v1236_v9  ;;  %1153 = vmatprep.subr.bf16.mxu1 %v1252_v17 }
  0x88   :  { %1123 = vmatprep.subr.bf16.mxu0 %v1237_v11 }
  0x8a   :  { %1154 = vmatpush3.bf16.msra.mxu1 %v1252_v17 }
  0x8b   :  { %1124 = vmatpush3.bf16.msra.mxu0 %v1237_v11  ;;  %1155 = vmatprep.subr.bf16.mxu1 %v1253_v23  ;;  %v1049_v11 = vld [vmem:[#allocation11 + $0x18] sm:$0xff]  }
  0x8c   :  { %1173 = vmatprep.subr.bf16.mxu0 %v1254_v24  ;;  %v989_v17 = vunpack.c.l.bf16 %v1049_v11 }
  0x8e   :  { %1126 = vmatmul.mubr.bf16.vlgmr.msra.gmra.mrb[0].mxu0 %v1239_v14  ;;  %1156 = vmatpush3.bf16.msra.mxu1 %v1253_v23  ;;  %v986_v23 = vunpack.c.h.bf16 %v1048_v13 }
  0x8f   :  { %1129 = vmatprep.mubr.bf16.mxu0 %v1240_v15  ;;  %1205 = vmatprep.subr.bf16.mxu1 %v1254_v24 }
  0x90   :  { %1174 = vmatpush3.bf16.msra.mxu0 %v1254_v24 }
  0x91   :  { %1175 = vmatprep.subr.bf16.mxu0 %v1255_v25 }
  0x94   :  { %1176 = vmatpush3.bf16.msra.mxu0 %v1255_v25 }
  0x95   :  { %1177 = vmatprep.subr.bf16.mxu0 %v1256_v26 }
  0x96   :  { %1130 = vmatmul.mubr.bf16.gmra.mrb[4].mxu0 %v1241_v18 }
  0x97   :  { %1133 = vmatprep.mubr.bf16.mxu0 %v1242_v19  ;;  %v990_v19 = vunpack.c.h.bf16 %v1049_v11 }
  0x98   :  { %1178 = vmatpush3.bf16.msra.mxu0 %v1256_v26 }
  0x99   :  { %1179 = vmatprep.subr.bf16.mxu0 %v1257_v27 }
  0x9c   :  { %1180 = vmatpush3.bf16.msra.mxu0 %v1257_v27 }
  0x9d   :  { %1181 = vmatprep.subr.bf16.mxu0 %v1258_v28 }
  0x9e   :  { %1134 = vmatmul.mubr.bf16.gmra.mrb[8].mxu0 %v1243_v20 }
  0x9f   :  { %1137 = vmatprep.mubr.bf16.mxu0 %v1244_v21  ;;  %v985_v21 = vunpack.c.l.bf16 %v1048_v13 }
  0xa0   :  { %1182 = vmatpush3.bf16.msra.mxu0 %v1258_v28 }
  0xa1   :  { %1183 = vmatprep.subr.bf16.mxu0 %v1259_v29 }
  0xa4   :  { %1184 = vmatpush3.bf16.msra.mxu0 %v1259_v29 }
  0xa5   :  { %1185 = vmatprep.subr.bf16.mxu0 %v1260_v54 }
  0xa6   :  { %1138 = vmatmul.mubr.bf16.gmra.mrb[12].mxu0 %v1245_v22 }
  0xa8   :  { %1186 = vmatpush3.bf16.msra.mxu0 %v1260_v54 }
  0xa9   :  { %1187 = vmatprep.subr.bf16.mxu0 %v1261_v55 }
  0xac   :  { %1188 = vmatpush3.bf16.msra.mxu0 %v1261_v55 }
 0x161   :  { %v1127_v30 = vpop.f32.mrb[0].mxu0 }
 0x162   :  { %v303_v31 = vpop.f32.mrb[1].mxu0 }
 0x163   :  { %v1128_v32 = vpop.f32.mrb[2].mxu0 }
 0x164   :  { %v418_v33 = vpack.c.bf16 %v1128_v32, %v1127_v30  ;;  %v306_v34 = vpop.f32.mrb[3].mxu0  ;;  %v1050_v32 = vld [vmem:[#allocation11 + $0x20] sm:$0xff]  }
 0x165   :  { %v417_v35 = vpack.c.bf16 %v306_v34, %v303_v31  ;;  %v1051_v31 = vld [vmem:[#allocation11 + $0x28] sm:$0xff]  }
 0x167   :  { %1157 = vmatprep.mubr.bf16.mxu1 %v417_v35 }
 0x168   :  { %1158 = vmatmul.mubr.bf16.vlgmr.msra.gmra.mrb[0].mxu1 %v418_v33 }
 0x169   :  { %v1131_v36 = vpop.f32.mrb[4].mxu0  ;;  %1213 = vmatpush3.bf16.msra.mxu1 %v1254_v24 }
 0x16a   :  { %v319_v37 = vpop.f32.mrb[5].mxu0  ;;  %1206 = vmatprep.subr.bf16.mxu1 %v1255_v25 }
 0x16b   :  { %v1132_v38 = vpop.f32.mrb[6].mxu0 }
 0x16c   :  { %v420_v39 = vpack.c.bf16 %v1132_v38, %v1131_v36  ;;  %v322_v40 = vpop.f32.mrb[7].mxu0 }
 0x16d   :  { %v419_v41 = vpack.c.bf16 %v322_v40, %v319_v37  ;;  %1214 = vmatpush3.bf16.msra.mxu1 %v1255_v25  ;;  %v997_v37 = vunpack.c.l.bf16 %v1051_v31 }
 0x16e   :  { %1207 = vmatprep.subr.bf16.mxu1 %v1256_v26 }
 0x16f   :  { %1161 = vmatprep.mubr.bf16.mxu1 %v419_v41  ;;  %v993_v41 = vunpack.c.l.bf16 %v1050_v32 }
 0x170   :  { %1162 = vmatmul.mubr.bf16.gmra.mrb[4].mxu1 %v420_v39  ;;  %v998_v39 = vunpack.c.h.bf16 %v1051_v31 }
 0x171   :  { %v1135_v42 = vpop.f32.mrb[8].mxu0  ;;  %1215 = vmatpush3.bf16.msra.mxu1 %v1256_v26 }
 0x172   :  { %v335_v43 = vpop.f32.mrb[9].mxu0  ;;  %1208 = vmatprep.subr.bf16.mxu1 %v1257_v27 }
 0x173   :  { %v1136_v44 = vpop.f32.mrb[10].mxu0 }
 0x174   :  { %v422_v45 = vpack.c.bf16 %v1136_v44, %v1135_v42  ;;  %v338_v46 = vpop.f32.mrb[11].mxu0 }
 0x175   :  { %v421_v47 = vpack.c.bf16 %v338_v46, %v335_v43  ;;  %1216 = vmatpush3.bf16.msra.mxu1 %v1257_v27  ;;  %v994_v43 = vunpack.c.h.bf16 %v1050_v32 }
 0x176   :  { %1209 = vmatprep.subr.bf16.mxu1 %v1258_v28 }
 0x177   :  { %1165 = vmatprep.mubr.bf16.mxu1 %v421_v47 }
 0x178   :  { %1166 = vmatmul.mubr.bf16.gmra.mrb[8].mxu1 %v422_v45 }
 0x179   :  { %v1139_v48 = vpop.f32.mrb[12].mxu0  ;;  %1217 = vmatpush3.bf16.msra.mxu1 %v1258_v28 }
 0x17a   :  { %v351_v49 = vpop.f32.mrb[13].mxu0  ;;  %1210 = vmatprep.subr.bf16.mxu1 %v1259_v29 }
 0x17b   :  { %v1140_v50 = vpop.f32.mrb[14].mxu0 }
 0x17c   :  { %v424_v51 = vpack.c.bf16 %v1140_v50, %v1139_v48  ;;  %v354_v52 = vpop.f32.mrb[15].mxu0 }
 0x17d   :  { %v423_v53 = vpack.c.bf16 %v354_v52, %v351_v49  ;;  %1218 = vmatpush3.bf16.msra.mxu1 %v1259_v29 }
 0x17e   :  { %1211 = vmatprep.subr.bf16.mxu1 %v1260_v54 }
 0x17f   :  { %1169 = vmatprep.mubr.bf16.mxu1 %v423_v53  ;;  %v1052_v53 = vld [vmem:[#allocation11 + $0x30] sm:$0xff]  }
 0x180   :  { %1170 = vmatmul.mubr.bf16.gmra.mrb[12].mxu1 %v424_v51  ;;  %v1053_v51 = vld [vmem:[#allocation11 + $0x38] sm:$0xff]  }
 0x181   :  { %1219 = vmatpush3.bf16.msra.mxu1 %v1260_v54  ;;  %v1005_v58 = vunpack.c.l.bf16 %v1053_v51 }
 0x182   :  { %1212 = vmatprep.subr.bf16.mxu1 %v1261_v55 }
 0x185   :  { %1220 = vmatpush3.bf16.msra.mxu1 %v1261_v55 }
 0x23b   :  { %v1159_v59 = vpop.f32.mrb[0].mxu1 }
 0x23c   :  { %v539_v60 = vadd.f32 %v1159_v59, %v1579_v56  ;;  %v530_v62 = vpop.f32.mrb[1].mxu1 }
 0x23d   :  { %v531_v0 = vadd.f32 %v1579_v56, %v530_v62  ;;  %v1160_v2 = vpop.f32.mrb[2].mxu1  ;;  %v1001_v62 = vunpack.c.l.bf16 %v1052_v53 }
 0x23e   :  { %v542_v4 = vadd.f32 %v1160_v2, %v1579_v56  ;;  %v533_v5 = vpop.f32.mrb[3].mxu1  ;;  %v627_v7 = vmul.f32 %v981_v61, %v539_v60  ;;  %v1006_v60 = vunpack.c.h.bf16 %v1053_v51 }
 0x23f   :  { %v534_v6 = vadd.f32 %v1579_v56, %v533_v5  ;;  %v625_v9 = vmul.f32 %v977_v1, %v531_v0  ;;  %v1002_v0 = vunpack.c.h.bf16 %v1052_v53 }
 0x240   :  { %v628_v8 = vmul.f32 %v982_v63, %v542_v4 }
 0x241   :  { %v626_v10 = vmul.f32 %v978_v3, %v534_v6 }
 0x242   :  { %v642_v12 = vpack.c.bf16 %v628_v8, %v627_v7 }
 0x243   :  { %v1163_v14 = vpop.f32.mrb[4].mxu1  ;;  %v641_v15 = vpack.c.bf16 %v626_v10, %v625_v9 }
 0x244   :  { %v555_v16 = vadd.f32 %v1163_v14, %v1579_v56  ;;  %v546_v18 = vpop.f32.mrb[5].mxu1 }
 0x245   :  { %v547_v20 = vadd.f32 %v1579_v56, %v546_v18  ;;  %v1164_v22 = vpop.f32.mrb[6].mxu1  ;;  %1189 = vmatprep.mubr.bf16.mxu0 %v641_v15 }
 0x246   :  { %v558_v24 = vadd.f32 %v1164_v22, %v1579_v56  ;;  %v549_v25 = vpop.f32.mrb[7].mxu1  ;;  %1190 = vmatmul.mubr.bf16.vlgmr.msra.gmra.mrb[16].mxu0 %v642_v12  ;;  %v631_v27 = vmul.f32 %v989_v17, %v555_v16 }
 0x247   :  { %v550_v26 = vadd.f32 %v1579_v56, %v549_v25  ;;  %v629_v29 = vmul.f32 %v985_v21, %v547_v20 }
 0x248   :  { %v632_v28 = vmul.f32 %v990_v19, %v558_v24 }
 0x249   :  { %v630_v30 = vmul.f32 %v986_v23, %v550_v26 }
 0x24a   :  { %v644_v33 = vpack.c.bf16 %v632_v28, %v631_v27 }
 0x24b   :  { %v1167_v34 = vpop.f32.mrb[8].mxu1  ;;  %v643_v35 = vpack.c.bf16 %v630_v30, %v629_v29 }
 0x24c   :  { %v571_v36 = vadd.f32 %v1167_v34, %v1579_v56  ;;  %v562_v38 = vpop.f32.mrb[9].mxu1 }
 0x24d   :  { %v563_v40 = vadd.f32 %v1579_v56, %v562_v38  ;;  %v1168_v42 = vpop.f32.mrb[10].mxu1  ;;  %1193 = vmatprep.mubr.bf16.mxu0 %v643_v35 }
 0x24e   :  { %v574_v44 = vadd.f32 %v1168_v42, %v1579_v56  ;;  %v565_v45 = vpop.f32.mrb[11].mxu1  ;;  %1194 = vmatmul.mubr.bf16.gmra.mrb[20].mxu0 %v644_v33  ;;  %v635_v47 = vmul.f32 %v997_v37, %v571_v36 }
 0x24f   :  { %v566_v46 = vadd.f32 %v1579_v56, %v565_v45  ;;  %v633_v49 = vmul.f32 %v993_v41, %v563_v40 }
 0x250   :  { %v636_v48 = vmul.f32 %v998_v39, %v574_v44 }
 0x251   :  { %v634_v50 = vmul.f32 %v994_v43, %v566_v46 }
 0x252   :  { %v646_v52 = vpack.c.bf16 %v636_v48, %v635_v47 }
 0x253   :  { %v1171_v54 = vpop.f32.mrb[12].mxu1  ;;  %v645_v55 = vpack.c.bf16 %v634_v50, %v633_v49 }
 0x254   :  { %v587_v57 = vadd.f32 %v1171_v54, %v1579_v56  ;;  %v578_v59 = vpop.f32.mrb[13].mxu1 }
 0x255   :  { %v579_v61 = vadd.f32 %v1579_v56, %v578_v59  ;;  %v1172_v63 = vpop.f32.mrb[14].mxu1  ;;  %1197 = vmatprep.mubr.bf16.mxu1 %v645_v55 }
 0x256   :  { %v590_v1 = vadd.f32 %v1172_v63, %v1579_v56  ;;  %v581_v2 = vpop.f32.mrb[15].mxu1  ;;  %1198 = vmatmul.mubr.bf16.vlgmr.msra.gmra.mrb[16].mxu1 %v646_v52  ;;  %v639_v4 = vmul.f32 %v1005_v58, %v587_v57 }
 0x257   :  { %v582_v3 = vadd.f32 %v1579_v56, %v581_v2  ;;  %v637_v6 = vmul.f32 %v1001_v62, %v579_v61 }
 0x258   :  { %v640_v5 = vmul.f32 %v1006_v60, %v590_v1 }
 0x259   :  { %v638_v7 = vmul.f32 %v1002_v0, %v582_v3 }
 0x25a   :  { %v648_v8 = vpack.c.bf16 %v640_v5, %v639_v4 }
 0x25b   :  { %v647_v9 = vpack.c.bf16 %v638_v7, %v637_v6 }
 0x25d   :  { %1201 = vmatprep.mubr.bf16.mxu1 %v647_v9 }
 0x25e   :  { %1202 = vmatmul.mubr.bf16.gmra.mrb[20].mxu1 %v648_v8 }
 0x319   :  { %v1191_v10 = vpop.f32.mrb[16].mxu0 }
 0x31a   :  { %v747_v11 = vpop.f32.mrb[17].mxu0 }
 0x31b   :  { %v1192_v12 = vpop.f32.mrb[18].mxu0 }
 0x31c   :  { %v1015_v13 = vpack.c.bf16 %v1192_v12, %v1191_v10  ;;  %v750_v14 = vpop.f32.mrb[19].mxu0 }
 0x31d   :  { %v1010_v15 = vpack.c.bf16 %v750_v14, %v747_v11 }
 0x31e   :  { %1054 = vst [vmem:[#allocation14 + $0x8] sm:$0xff] %v1015_v13  }
 0x31f   :  { %1011 = vst [vmem:[#allocation14] sm:$0xff] %v1010_v15  }
 0x321   :  { %v1195_v16 = vpop.f32.mrb[20].mxu0 }
 0x322   :  { %v763_v17 = vpop.f32.mrb[21].mxu0 }
 0x323   :  { %v1196_v18 = vpop.f32.mrb[22].mxu0 }
 0x324   :  { %v1025_v56 = vpack.c.bf16 %v1196_v18, %v1195_v16  ;;  %v766_v19 = vpop.f32.mrb[23].mxu0 }
 0x325   :  { %v1020_v20 = vpack.c.bf16 %v766_v19, %v763_v17 }
 0x326   :  { %1056 = vst [vmem:[#allocation14 + $0x18] sm:$0xff] %v1025_v56  }
 0x327   :  { %1055 = vst [vmem:[#allocation14 + $0x10] sm:$0xff] %v1020_v20  }
 0x329   :  { %v1199_v21 = vpop.f32.mrb[16].mxu1 }
 0x32a   :  { %v779_v22 = vpop.f32.mrb[17].mxu1 }
 0x32b   :  { %v1200_v23 = vpop.f32.mrb[18].mxu1 }
 0x32c   :  { %v1035_v24 = vpack.c.bf16 %v1200_v23, %v1199_v21  ;;  %v782_v25 = vpop.f32.mrb[19].mxu1 }
 0x32d   :  { %v1030_v26 = vpack.c.bf16 %v782_v25, %v779_v22 }
 0x32e   :  { %1058 = vst [vmem:[#allocation14 + $0x28] sm:$0xff] %v1035_v24  }
 0x32f   :  { %1057 = vst [vmem:[#allocation14 + $0x20] sm:$0xff] %v1030_v26  }
 0x331   :  { %v1203_v27 = vpop.f32.mrb[20].mxu1 }
 0x332   :  { %v795_v28 = vpop.f32.mrb[21].mxu1 }
 0x333   :  { %v1204_v29 = vpop.f32.mrb[22].mxu1 }
 0x334   :  { %v1045_v30 = vpack.c.bf16 %v1204_v29, %v1203_v27  ;;  %v798_v31 = vpop.f32.mrb[23].mxu1 }
 0x335   :  { %v1040_v32 = vpack.c.bf16 %v798_v31, %v795_v28 }
 0x336   :  { %1060 = vst [vmem:[#allocation14 + $0x38] sm:$0xff] %v1045_v30  }
 0x337   :  { %1059 = vst [vmem:[#allocation14 + $0x30] sm:$0xff] %v1040_v32  }
 0x338   :  { %1405 = shalt.err (!%p1402_p10)
}
 0x339   :  { %s1406_s23 = scalar_lea.hbm %s1618_s6, 1024 }
 0x33a   :  { %p1407_p11 = scmp.ne.s32.totalorder %s1618_s6, %s1406_s23  ;;  %p1410_p12 = scmp.lt.u32.totalorder %s1406_s23, %s1618_s6 }
 0x33c   :  { %p1412_p13 = pnand %p1410_p12, %p1407_p11 }
 0x33e   :  { %1415 = shalt.err (!%p1412_p13)
}
 0x33f   :  { %901 = dma.vmem_to_hbm [thread:$0]  %s896_s1, 1024, %s1618_s6, [#allocation5], %s1428_s9, %s1428_s9, %s1429_s10  }
 0x340   :  { %1424 = dma.done.wait [#allocation5], 1024  }
 0x341   :  { %1425 = vsyncadd [#allocation5], 4294966272 }
 0x342   :  { %905 = vsyncpa [#allocation4], 1 }
 0x343   :  { %906 = vsyncpa [#allocation7], 1 }
 0x344   :  { %907 = vsyncpa [#allocation10], 1 }
 0x345   :  { %908 = vsyncpa [#allocation13], 1 }
 0x346   :  { %909 = vsyncpa [#allocation5], 1 }

</bundles_post_ra>
